<compile_context>
chip_gen: v5e
topology: v5e:2x2
jax: 0.10.0
libtpu: 0.0.40
codegen_flags: <defaults>
</compile_context>

<pallas_src>
import functools

import jax
import jax.numpy as jnp
from jax.experimental import pallas as pl
from jax.experimental.pallas import tpu as pltpu


def _attention_kernel(q_ref, k_ref, v_ref,
                      wqt_ref, bq_ref, wkt_ref, bk_ref,
                      wvd_ref, bvd_ref, bd_ref,
                      o_ref,
                      kt_ref, vd_ref,
                      *, num_heads, proj_dim):
    f32 = jnp.float32
    bf16 = jnp.bfloat16
    H, pd = num_heads, proj_dim
    S = k_ref.shape[0]
    TQ = q_ref.shape[0]

    # ---- Per-batch work, hoisted off the query-tile (t) axis ----------------
    # Recomputed only at t == 0; kt_ref / vd_ref persist across t steps.
    @pl.when(pl.program_id(1) == 0)
    def _():
        # K^T projection for all heads in one full-width MXU matmul:
        #   KT[o, s] = sum_i Wk[i, o] * k[s, i] + bk[o]
        kt = jax.lax.dot_general(
            wkt_ref[...], k_ref[...],
            dimension_numbers=(((1,), (1,)), ((), ())),
            preferred_element_type=f32) + bk_ref[...]
        # (Dout, S) -> (H, pd, S): major-dim split only, lane dim untouched.
        kt_ref[...] = kt.astype(bf16).reshape(H, pd, S)

        # V projection folded with the final dense layer per head:
        #   Vd_h = v @ (Wv_h @ Wd_h) + bv_h @ Wd_h          (shape (S, Dout))
        # so attn @ Vd produces full 128-lane outputs and the head-merge
        # (masked 16-lane stripe stores) plus the separate dense matmul vanish.
        for h in range(H):
            vd = jnp.dot(v_ref[...], wvd_ref[h],
                         preferred_element_type=f32) + bvd_ref[h]
            vd_ref[h] = vd.astype(bf16)

    # ---- Per-tile work -------------------------------------------------------
    # Q^T projection (full-width matmul); bias and 1/sqrt(pd) folded into Q once.
    qt = jax.lax.dot_general(
        wqt_ref[...], q_ref[...],
        dimension_numbers=(((1,), (1,)), ((), ())),
        preferred_element_type=f32) + bq_ref[...]
    qt = qt * (1.0 / jnp.sqrt(jnp.float32(pd)))
    qh = qt.astype(bf16).reshape(H, pd, TQ)            # (H, pd, TQ)

    # Logits for all heads: one batched contraction over pd (flash-bwd pattern).
    logits = jax.lax.dot_general(                      # (H, TQ, S), f32
        qh, kt_ref[...],
        dimension_numbers=(((1,), (1,)), ((0,), (0,))),
        preferred_element_type=f32)

    # Softmax in f32; denominator reciprocal on the EUP (approx; ~1e-3 rel).
    m = jnp.max(logits, axis=-1, keepdims=True)
    p = jnp.exp(logits - m)
    denom = jnp.sum(p, axis=-1, keepdims=True)
    attn = (p * pl.reciprocal(denom, approx=True)).astype(bf16)

    # attn @ Vd: canonical batched matmul with lane-dense (Dout) outputs per
    # head, then a pure-VPU reduce over heads and the dense bias.
    o_h = jax.lax.dot_general(                         # (H, TQ, Dout), f32
        attn, vd_ref[...],
        dimension_numbers=(((2,), (1,)), ((0,), (0,))),
        preferred_element_type=f32)
    out = jnp.sum(o_h, axis=0) + bd_ref[...]
    o_ref[...] = out.astype(o_ref.dtype)


def _vmem_capacity_bytes():
    try:
        return int(pltpu.get_tpu_info().vmem_capacity_bytes)
    except Exception:
        return 64 * 1024 * 1024          # conservative (v7x-sized) fallback


def _pick_q_tile(S, Din, Dout, num_heads, budget_bytes):
    """Largest query tile whose working set fits the VMEM budget."""
    H = num_heads
    fixed = (Dout * S * 2                               # K^T scratch (H,pd,S) bf16
             + H * S * Dout * 2                         # Vd scratch (H,S,Dout) bf16
             + 2 * S * Din * 2                          # k, v slabs (bf16, 1-buffered)
             + (2 * Dout * Din + H * Din * Dout) * 2    # bf16 weights
             + (3 * Dout + H * Dout) * 4)               # f32 biases
    candidates = [t for t in (1024, 512, 256, 128, 64, 32, 16, 8)
                  if t <= S and S % t == 0]
    if not candidates:
        return S
    for t in candidates:
        per_tile = (H * t * S * (4 + 4 + 2)   # logits f32 + exp f32 + attn bf16
                    + H * t * Dout * 4        # per-head attn@Vd outputs f32
                    + t * Dout * (4 + 2)      # Q^T f32 + bf16 copies
                    + 2 * t * Din * 2         # double-buffered q tile (bf16)
                    + 2 * t * Dout * 4)       # double-buffered out tile (f32)
        if fixed + per_tile <= budget_bytes:
            return t
    return candidates[-1]


def attention_pallas(q, k, v, params, *, num_heads):
    """q, k, v: (B, S, input_dim) float32.  Returns (B, S, output_dim) f32."""
    B, S, Din = q.shape
    Dout = params["wq"].shape[1]
    assert Dout % num_heads == 0
    H = num_heads
    pd = Dout // H

    # VMEM-derived tiling / scoped limit (64 MiB on v7x, 128 MiB on v5e/v6e).
    vmem_cap = _vmem_capacity_bytes()
    vmem_limit = max(32 * 1024 * 1024, vmem_cap - 20 * 1024 * 1024)
    TQ = _pick_q_tile(S, Din, Dout, H, int(0.85 * vmem_limit))
    assert S % TQ == 0

    bf16 = jnp.bfloat16
    f32 = jnp.float32

    # bf16 MXU operands; biases stay f32 (added to f32 accumulators).
    qb, kb, vb = q.astype(bf16), k.astype(bf16), v.astype(bf16)

    # Head-major weight relayouts + the Wv@Wd fold happen ONCE here (plain XLA),
    # so the kernel never lane-slices 16-wide head stripes.
    wqt = params["wq"].T.astype(bf16)                           # (Dout, Din)
    wkt = params["wk"].T.astype(bf16)                           # (Dout, Din)
    bq = params["bq"].reshape(Dout, 1).astype(f32)
    bk = params["bk"].reshape(Dout, 1).astype(f32)
    wvh = params["wv"].reshape(Din, H, pd).transpose(1, 0, 2)   # (H, Din, pd)
    wdh = params["wd"].reshape(H, pd, Dout)                     # (H, pd, Dout)
    wvd = jnp.einsum("hdp,hpo->hdo", wvh, wdh).astype(bf16)     # (H, Din, Dout)
    bvd = jnp.einsum("hp,hpo->ho", params["bv"].reshape(H, pd), wdh)
    bvd = bvd.reshape(H, 1, Dout).astype(f32)                   # (H, 1, Dout)
    bd = params["bd"].reshape(1, Dout).astype(f32)

    kernel = functools.partial(_attention_kernel, num_heads=H, proj_dim=pd)

    inv = pl.Buffered(1)   # grid-invariant along t: fetch once, no double buffer

    q_spec = pl.BlockSpec((None, TQ, Din), lambda b, t: (b, t, 0))
    kv_spec = pl.BlockSpec((None, S, Din), lambda b, t: (b, 0, 0),
                           pipeline_mode=inv)
    wqk_spec = pl.BlockSpec((Dout, Din), lambda b, t: (0, 0), pipeline_mode=inv)
    bqk_spec = pl.BlockSpec((Dout, 1), lambda b, t: (0, 0), pipeline_mode=inv)
    wvd_spec = pl.BlockSpec((H, Din, Dout), lambda b, t: (0, 0, 0),
                            pipeline_mode=inv)
    bvd_spec = pl.BlockSpec((H, 1, Dout), lambda b, t: (0, 0, 0),
                            pipeline_mode=inv)
    bd_spec = pl.BlockSpec((1, Dout), lambda b, t: (0, 0), pipeline_mode=inv)
    out_spec = pl.BlockSpec((None, TQ, Dout), lambda b, t: (b, t, 0))

    # Advisory cost model reflecting actual per-batch / per-tile traffic.
    flops = B * (2 * S * Din * Dout              # K^T projection (per batch)
                 + H * 2 * S * Din * Dout        # folded V@Wd projection (per batch)
                 + 2 * S * Din * Dout            # Q projection (all tiles)
                 + 2 * H * S * S * pd            # logits
                 + 2 * H * S * S * Dout)         # attn @ Vd
    transcendentals = B * H * S * S              # exp in softmax
    bytes_accessed = (2 * 3 * B * S * Din                       # bf16 q, k, v (per b)
                      + 2 * (2 * Dout * Din + H * Din * Dout)   # bf16 weights (once)
                      + 4 * (3 * Dout + H * Dout)               # f32 biases (once)
                      + 4 * B * S * Dout)                       # f32 output

    return pl.pallas_call(
        kernel,
        out_shape=jax.ShapeDtypeStruct((B, S, Dout), jnp.float32),
        grid_spec=pltpu.PrefetchScalarGridSpec(
            num_scalar_prefetch=0,
            grid=(B, S // TQ),
            in_specs=[q_spec, kv_spec, kv_spec,
                      wqk_spec, bqk_spec,
                      wqk_spec, bqk_spec,
                      wvd_spec, bvd_spec, bd_spec],
            out_specs=out_spec,
            scratch_shapes=[pltpu.VMEM((H, pd, S), bf16),       # K^T per head
                            pltpu.VMEM((H, S, Dout), bf16)]),   # folded V@Wd per head
        compiler_params=pltpu.CompilerParams(
            # b stays "parallel" (v7x megacore sharding); t must be "arbitrary"
            # so the per-batch K/V scratch carries across query tiles.
            dimension_semantics=("parallel", "arbitrary"),
            vmem_limit_bytes=vmem_limit),
        cost_estimate=pl.CostEstimate(
            flops=flops, transcendentals=transcendentals,
            bytes_accessed=bytes_accessed),
    )(qb, kb, vb, wqt, bq, wkt, bk, wvd, bvd, bd)


def _xavier_uniform(key, fan_in, fan_out):
    # Matches torch.nn.init.xavier_uniform_ (gain=1): U(-a, a), a=sqrt(6/(fi+fo)).
    a = jnp.sqrt(6.0 / (fan_in + fan_out))
    # Stored as (in, out) so the math is x @ W.
    return jax.random.uniform(key, (fan_in, fan_out), jnp.float32, -a, a)


def init_params(key, input_dim, output_dim):
    kq, kk, kv, kd = jax.random.split(key, 4)
    return {
        "wq": _xavier_uniform(kq, input_dim, output_dim),
        "bq": jnp.zeros((1, output_dim), jnp.float32),
        "wk": _xavier_uniform(kk, input_dim, output_dim),
        "bk": jnp.zeros((1, output_dim), jnp.float32),
        "wv": _xavier_uniform(kv, input_dim, output_dim),
        "bv": jnp.zeros((1, output_dim), jnp.float32),
        "wd": _xavier_uniform(kd, output_dim, output_dim),
        "bd": jnp.zeros((1, output_dim), jnp.float32),
    }


def attention_reference(q, k, v, params, *, num_heads):
    """Pure-JAX f32 reference mirroring the PyTorch module (isMultiHead=True)."""
    B, S, _ = q.shape
    Dout = params["wq"].shape[1]
    pd = Dout // num_heads
    Q = q @ params["wq"] + params["bq"]
    K = k @ params["wk"] + params["bk"]
    V = v @ params["wv"] + params["bv"]

    def split(x):
        return x.reshape(B, S, num_heads, pd).transpose(0, 2, 1, 3)

    Qh, Kh, Vh = split(Q), split(K), split(V)
    logits = jnp.einsum("bhqd,bhkd->bhqk", Qh, Kh) / jnp.sqrt(jnp.float32(pd))
    attn = jax.nn.softmax(logits, axis=-1)
    out = jnp.einsum("bhqk,bhkd->bhqd", attn, Vh)
    out = out.transpose(0, 2, 1, 3).reshape(B, S, Dout)
    return out @ params["wd"] + params["bd"]


if __name__ == "__main__":
    B, S = 2, 16
    INPUT_DIM, OUTPUT_DIM, NUM_HEADS = 64, 128, 8   # pd = 16; Dout lane-dense

    root = jax.random.PRNGKey(0)
    kp, kq, kk, kv = jax.random.split(root, 4)
    params = init_params(kp, INPUT_DIM, OUTPUT_DIM)

    q = jax.random.normal(kq, (B, S, INPUT_DIM), jnp.float32)
    k = jax.random.normal(kk, (B, S, INPUT_DIM), jnp.float32)
    v = jax.random.normal(kv, (B, S, INPUT_DIM), jnp.float32)

    out = attention_pallas(q, k, v, params, num_heads=NUM_HEADS)
    out = jax.block_until_ready(out)

    ref = attention_reference(q, k, v, params, num_heads=NUM_HEADS)
    assert out.shape == (B, S, OUTPUT_DIM)
    # Tolerance sized for bf16 MXU inputs (f32 accumulation) vs an f32 reference.
    rel_err = jnp.max(jnp.abs(out - ref)) / (jnp.max(jnp.abs(ref)) + 1e-6)
    assert rel_err < 6e-2, f"relative max error too high: {rel_err}"
    print("KERNEL_OK")
</pallas_src>

<mosaic_0001>
module attributes {stable_mosaic.version = 11 : i64} {
  func.func @_attention_kernel(%arg0: i32, %arg1: i32, %arg2: memref<1x16x64xbf16, #tpu.memory_space<vmem>>, %arg3: memref<1x16x64xbf16, #tpu.memory_space<vmem>>, %arg4: memref<1x16x64xbf16, #tpu.memory_space<vmem>>, %arg5: memref<128x64xbf16, #tpu.memory_space<vmem>>, %arg6: memref<128x1xf32, #tpu.memory_space<vmem>>, %arg7: memref<128x64xbf16, #tpu.memory_space<vmem>>, %arg8: memref<128x1xf32, #tpu.memory_space<vmem>>, %arg9: memref<8x64x128xbf16, #tpu.memory_space<vmem>>, %arg10: memref<8x1x128xf32, #tpu.memory_space<vmem>>, %arg11: memref<1x128xf32, #tpu.memory_space<vmem>>, %arg12: memref<1x16x128xf32, #tpu.memory_space<vmem>>, %arg13: memref<8x16x16xbf16, #tpu.memory_space<vmem>>, %arg14: memref<8x16x128xbf16, #tpu.memory_space<vmem>>) attributes {dimension_semantics = [#tpu.dimension_semantics<parallel>, #tpu.dimension_semantics<arbitrary>], iteration_bounds = array<i64: 2, 1>, scalar_prefetch = 0 : i64, scratch_operands = 2 : i64, tpu.core_type = #tpu.core_type<tc>, window_params = [{transform_indices = @transform_0, window_bounds = array<i64: 1, 16, 64>}, {pipeline_mode = #tpu.pipeline_mode<synchronous>, transform_indices = @transform_1, window_bounds = array<i64: 1, 16, 64>}, {pipeline_mode = #tpu.pipeline_mode<synchronous>, transform_indices = @transform_2, window_bounds = array<i64: 1, 16, 64>}, {pipeline_mode = #tpu.pipeline_mode<synchronous>, transform_indices = @transform_3, window_bounds = array<i64: 128, 64>}, {pipeline_mode = #tpu.pipeline_mode<synchronous>, transform_indices = @transform_4, window_bounds = array<i64: 128, 1>}, {pipeline_mode = #tpu.pipeline_mode<synchronous>, transform_indices = @transform_5, window_bounds = array<i64: 128, 64>}, {pipeline_mode = #tpu.pipeline_mode<synchronous>, transform_indices = @transform_6, window_bounds = array<i64: 128, 1>}, {pipeline_mode = #tpu.pipeline_mode<synchronous>, transform_indices = @transform_7, window_bounds = array<i64: 8, 64, 128>}, {pipeline_mode = #tpu.pipeline_mode<synchronous>, transform_indices = @transform_8, window_bounds = array<i64: 8, 1, 128>}, {pipeline_mode = #tpu.pipeline_mode<synchronous>, transform_indices = @transform_9, window_bounds = array<i64: 1, 128>}, {transform_indices = @transform_10, window_bounds = array<i64: 1, 16, 128>}]} {
    %c0_i32 = arith.constant 0 : i32
    %0 = arith.cmpi eq, %arg1, %c0_i32 : i32
    %1 = arith.extui %0 : i1 to i32
    %c0_i32_0 = arith.constant 0 : i32
    %2 = arith.cmpi ne, %1, %c0_i32_0 : i32
    scf.if %2 {
      %c0_25 = arith.constant 0 : index
      %c0_26 = arith.constant 0 : index
      %38 = vector.load %arg7[%c0_25, %c0_26] : memref<128x64xbf16, #tpu.memory_space<vmem>>, vector<128x64xbf16>
      %c0_27 = arith.constant 0 : index
      %c0_28 = arith.constant 0 : index
      %c0_29 = arith.constant 0 : index
      %39 = vector.load %arg3[%c0_27, %c0_28, %c0_29] : memref<1x16x64xbf16, #tpu.memory_space<vmem>>, vector<1x16x64xbf16>
      %40 = vector.shape_cast %39 : vector<1x16x64xbf16> to vector<16x64xbf16>
      %cst_30 = arith.constant dense<0.000000e+00> : vector<128x16xf32>
      %41 = tpu.matmul %38, %40, %cst_30 {dimension_numbers = #tpu.dot_dimension_numbers<[1], [1], [0], [0], [0, 0, 1, 0], [], []>} : vector<128x64xbf16>, vector<16x64xbf16>, vector<128x16xf32> -> vector<128x16xf32>
      %c0_31 = arith.constant 0 : index
      %c0_32 = arith.constant 0 : index
      %42 = vector.load %arg8[%c0_31, %c0_32] : memref<128x1xf32, #tpu.memory_space<vmem>>, vector<128x1xf32>
      %43 = vector.broadcast %42 : vector<128x1xf32> to vector<128x16xf32>
      %44 = arith.addf %41, %43 : vector<128x16xf32>
      %45 = arith.truncf %44 : vector<128x16xf32> to vector<128x16xbf16>
      %46 = vector.shape_cast %45 : vector<128x16xbf16> to vector<8x16x16xbf16>
      %c0_33 = arith.constant 0 : index
      %c0_34 = arith.constant 0 : index
      %c0_35 = arith.constant 0 : index
      %47 = vector.load %arg13[%c0_33, %c0_34, %c0_35] : memref<8x16x16xbf16, #tpu.memory_space<vmem>>, vector<8x16x16xbf16>
      tpu.vector_store %arg13[%c0_33, %c0_34, %c0_35], %46 {strides = array<i32>} : memref<8x16x16xbf16, #tpu.memory_space<vmem>>, vector<8x16x16xbf16>,
      %c0_36 = arith.constant 0 : index
      %c0_37 = arith.constant 0 : index
      %c0_38 = arith.constant 0 : index
      %48 = vector.load %arg4[%c0_36, %c0_37, %c0_38] : memref<1x16x64xbf16, #tpu.memory_space<vmem>>, vector<1x16x64xbf16>
      %49 = vector.shape_cast %48 : vector<1x16x64xbf16> to vector<16x64xbf16>
      %c0_39 = arith.constant 0 : index
      %c0_40 = arith.constant 0 : index
      %c0_41 = arith.constant 0 : index
      %50 = vector.load %arg9[%c0_39, %c0_40, %c0_41] : memref<8x64x128xbf16, #tpu.memory_space<vmem>>, vector<1x64x128xbf16>
      %51 = vector.shape_cast %50 : vector<1x64x128xbf16> to vector<64x128xbf16>
      %cst_42 = arith.constant dense<0.000000e+00> : vector<16x128xf32>
      %52 = tpu.matmul %49, %51, %cst_42 {dimension_numbers = #tpu.dot_dimension_numbers<[1], [0], [0], [1], [0, 0, 1, 1], [], []>} : vector<16x64xbf16>, vector<64x128xbf16>, vector<16x128xf32> -> vector<16x128xf32>
      %c0_43 = arith.constant 0 : index
      %c0_44 = arith.constant 0 : index
      %c0_45 = arith.constant 0 : index
      %53 = vector.load %arg10[%c0_43, %c0_44, %c0_45] : memref<8x1x128xf32, #tpu.memory_space<vmem>>, vector<1x1x128xf32>
      %54 = vector.shape_cast %53 : vector<1x1x128xf32> to vector<1x128xf32>
      %55 = vector.broadcast %54 : vector<1x128xf32> to vector<16x128xf32>
      %56 = arith.addf %52, %55 : vector<16x128xf32>
      %57 = arith.truncf %56 : vector<16x128xf32> to vector<16x128xbf16>
      %c0_46 = arith.constant 0 : index
      %c0_47 = arith.constant 0 : index
      %c0_48 = arith.constant 0 : index
      %58 = vector.load %arg14[%c0_46, %c0_47, %c0_48] : memref<8x16x128xbf16, #tpu.memory_space<vmem>>, vector<1x16x128xbf16>
      %59 = vector.shape_cast %58 : vector<1x16x128xbf16> to vector<16x128xbf16>
      %60 = vector.shape_cast %57 : vector<16x128xbf16> to vector<1x16x128xbf16>
      tpu.vector_store %arg14[%c0_46, %c0_47, %c0_48], %60 {strides = array<i32>} : memref<8x16x128xbf16, #tpu.memory_space<vmem>>, vector<1x16x128xbf16>,
      %c0_49 = arith.constant 0 : index
      %c0_50 = arith.constant 0 : index
      %c0_51 = arith.constant 0 : index
      %61 = vector.load %arg4[%c0_49, %c0_50, %c0_51] : memref<1x16x64xbf16, #tpu.memory_space<vmem>>, vector<1x16x64xbf16>
      %62 = vector.shape_cast %61 : vector<1x16x64xbf16> to vector<16x64xbf16>
      %c1 = arith.constant 1 : index
      %c0_52 = arith.constant 0 : index
      %c0_53 = arith.constant 0 : index
      %63 = vector.load %arg9[%c1, %c0_52, %c0_53] : memref<8x64x128xbf16, #tpu.memory_space<vmem>>, vector<1x64x128xbf16>
      %64 = vector.shape_cast %63 : vector<1x64x128xbf16> to vector<64x128xbf16>
      %cst_54 = arith.constant dense<0.000000e+00> : vector<16x128xf32>
      %65 = tpu.matmul %62, %64, %cst_54 {dimension_numbers = #tpu.dot_dimension_numbers<[1], [0], [0], [1], [0, 0, 1, 1], [], []>} : vector<16x64xbf16>, vector<64x128xbf16>, vector<16x128xf32> -> vector<16x128xf32>
      %c1_55 = arith.constant 1 : index
      %c0_56 = arith.constant 0 : index
      %c0_57 = arith.constant 0 : index
      %66 = vector.load %arg10[%c1_55, %c0_56, %c0_57] : memref<8x1x128xf32, #tpu.memory_space<vmem>>, vector<1x1x128xf32>
      %67 = vector.shape_cast %66 : vector<1x1x128xf32> to vector<1x128xf32>
      %68 = vector.broadcast %67 : vector<1x128xf32> to vector<16x128xf32>
      %69 = arith.addf %65, %68 : vector<16x128xf32>
      %70 = arith.truncf %69 : vector<16x128xf32> to vector<16x128xbf16>
      %c1_58 = arith.constant 1 : index
      %c0_59 = arith.constant 0 : index
      %c0_60 = arith.constant 0 : index
      %71 = vector.load %arg14[%c1_58, %c0_59, %c0_60] : memref<8x16x128xbf16, #tpu.memory_space<vmem>>, vector<1x16x128xbf16>
      %72 = vector.shape_cast %71 : vector<1x16x128xbf16> to vector<16x128xbf16>
      %73 = vector.shape_cast %70 : vector<16x128xbf16> to vector<1x16x128xbf16>
      tpu.vector_store %arg14[%c1_58, %c0_59, %c0_60], %73 {strides = array<i32>} : memref<8x16x128xbf16, #tpu.memory_space<vmem>>, vector<1x16x128xbf16>,
      %c0_61 = arith.constant 0 : index
      %c0_62 = arith.constant 0 : index
      %c0_63 = arith.constant 0 : index
      %74 = vector.load %arg4[%c0_61, %c0_62, %c0_63] : memref<1x16x64xbf16, #tpu.memory_space<vmem>>, vector<1x16x64xbf16>
      %75 = vector.shape_cast %74 : vector<1x16x64xbf16> to vector<16x64xbf16>
      %c2 = arith.constant 2 : index
      %c0_64 = arith.constant 0 : index
      %c0_65 = arith.constant 0 : index
      %76 = vector.load %arg9[%c2, %c0_64, %c0_65] : memref<8x64x128xbf16, #tpu.memory_space<vmem>>, vector<1x64x128xbf16>
      %77 = vector.shape_cast %76 : vector<1x64x128xbf16> to vector<64x128xbf16>
      %cst_66 = arith.constant dense<0.000000e+00> : vector<16x128xf32>
      %78 = tpu.matmul %75, %77, %cst_66 {dimension_numbers = #tpu.dot_dimension_numbers<[1], [0], [0], [1], [0, 0, 1, 1], [], []>} : vector<16x64xbf16>, vector<64x128xbf16>, vector<16x128xf32> -> vector<16x128xf32>
      %c2_67 = arith.constant 2 : index
      %c0_68 = arith.constant 0 : index
      %c0_69 = arith.constant 0 : index
      %79 = vector.load %arg10[%c2_67, %c0_68, %c0_69] : memref<8x1x128xf32, #tpu.memory_space<vmem>>, vector<1x1x128xf32>
      %80 = vector.shape_cast %79 : vector<1x1x128xf32> to vector<1x128xf32>
      %81 = vector.broadcast %80 : vector<1x128xf32> to vector<16x128xf32>
      %82 = arith.addf %78, %81 : vector<16x128xf32>
      %83 = arith.truncf %82 : vector<16x128xf32> to vector<16x128xbf16>
      %c2_70 = arith.constant 2 : index
      %c0_71 = arith.constant 0 : index
      %c0_72 = arith.constant 0 : index
      %84 = vector.load %arg14[%c2_70, %c0_71, %c0_72] : memref<8x16x128xbf16, #tpu.memory_space<vmem>>, vector<1x16x128xbf16>
      %85 = vector.shape_cast %84 : vector<1x16x128xbf16> to vector<16x128xbf16>
      %86 = vector.shape_cast %83 : vector<16x128xbf16> to vector<1x16x128xbf16>
      tpu.vector_store %arg14[%c2_70, %c0_71, %c0_72], %86 {strides = array<i32>} : memref<8x16x128xbf16, #tpu.memory_space<vmem>>, vector<1x16x128xbf16>,
      %c0_73 = arith.constant 0 : index
      %c0_74 = arith.constant 0 : index
      %c0_75 = arith.constant 0 : index
      %87 = vector.load %arg4[%c0_73, %c0_74, %c0_75] : memref<1x16x64xbf16, #tpu.memory_space<vmem>>, vector<1x16x64xbf16>
      %88 = vector.shape_cast %87 : vector<1x16x64xbf16> to vector<16x64xbf16>
      %c3 = arith.constant 3 : index
      %c0_76 = arith.constant 0 : index
      %c0_77 = arith.constant 0 : index
      %89 = vector.load %arg9[%c3, %c0_76, %c0_77] : memref<8x64x128xbf16, #tpu.memory_space<vmem>>, vector<1x64x128xbf16>
      %90 = vector.shape_cast %89 : vector<1x64x128xbf16> to vector<64x128xbf16>
      %cst_78 = arith.constant dense<0.000000e+00> : vector<16x128xf32>
      %91 = tpu.matmul %88, %90, %cst_78 {dimension_numbers = #tpu.dot_dimension_numbers<[1], [0], [0], [1], [0, 0, 1, 1], [], []>} : vector<16x64xbf16>, vector<64x128xbf16>, vector<16x128xf32> -> vector<16x128xf32>
      %c3_79 = arith.constant 3 : index
      %c0_80 = arith.constant 0 : index
      %c0_81 = arith.constant 0 : index
      %92 = vector.load %arg10[%c3_79, %c0_80, %c0_81] : memref<8x1x128xf32, #tpu.memory_space<vmem>>, vector<1x1x128xf32>
      %93 = vector.shape_cast %92 : vector<1x1x128xf32> to vector<1x128xf32>
      %94 = vector.broadcast %93 : vector<1x128xf32> to vector<16x128xf32>
      %95 = arith.addf %91, %94 : vector<16x128xf32>
      %96 = arith.truncf %95 : vector<16x128xf32> to vector<16x128xbf16>
      %c3_82 = arith.constant 3 : index
      %c0_83 = arith.constant 0 : index
      %c0_84 = arith.constant 0 : index
      %97 = vector.load %arg14[%c3_82, %c0_83, %c0_84] : memref<8x16x128xbf16, #tpu.memory_space<vmem>>, vector<1x16x128xbf16>
      %98 = vector.shape_cast %97 : vector<1x16x128xbf16> to vector<16x128xbf16>
      %99 = vector.shape_cast %96 : vector<16x128xbf16> to vector<1x16x128xbf16>
      tpu.vector_store %arg14[%c3_82, %c0_83, %c0_84], %99 {strides = array<i32>} : memref<8x16x128xbf16, #tpu.memory_space<vmem>>, vector<1x16x128xbf16>,
      %c0_85 = arith.constant 0 : index
      %c0_86 = arith.constant 0 : index
      %c0_87 = arith.constant 0 : index
      %100 = vector.load %arg4[%c0_85, %c0_86, %c0_87] : memref<1x16x64xbf16, #tpu.memory_space<vmem>>, vector<1x16x64xbf16>
      %101 = vector.shape_cast %100 : vector<1x16x64xbf16> to vector<16x64xbf16>
      %c4 = arith.constant 4 : index
      %c0_88 = arith.constant 0 : index
      %c0_89 = arith.constant 0 : index
      %102 = vector.load %arg9[%c4, %c0_88, %c0_89] : memref<8x64x128xbf16, #tpu.memory_space<vmem>>, vector<1x64x128xbf16>
      %103 = vector.shape_cast %102 : vector<1x64x128xbf16> to vector<64x128xbf16>
      %cst_90 = arith.constant dense<0.000000e+00> : vector<16x128xf32>
      %104 = tpu.matmul %101, %103, %cst_90 {dimension_numbers = #tpu.dot_dimension_numbers<[1], [0], [0], [1], [0, 0, 1, 1], [], []>} : vector<16x64xbf16>, vector<64x128xbf16>, vector<16x128xf32> -> vector<16x128xf32>
      %c4_91 = arith.constant 4 : index
      %c0_92 = arith.constant 0 : index
      %c0_93 = arith.constant 0 : index
      %105 = vector.load %arg10[%c4_91, %c0_92, %c0_93] : memref<8x1x128xf32, #tpu.memory_space<vmem>>, vector<1x1x128xf32>
      %106 = vector.shape_cast %105 : vector<1x1x128xf32> to vector<1x128xf32>
      %107 = vector.broadcast %106 : vector<1x128xf32> to vector<16x128xf32>
      %108 = arith.addf %104, %107 : vector<16x128xf32>
      %109 = arith.truncf %108 : vector<16x128xf32> to vector<16x128xbf16>
      %c4_94 = arith.constant 4 : index
      %c0_95 = arith.constant 0 : index
      %c0_96 = arith.constant 0 : index
      %110 = vector.load %arg14[%c4_94, %c0_95, %c0_96] : memref<8x16x128xbf16, #tpu.memory_space<vmem>>, vector<1x16x128xbf16>
      %111 = vector.shape_cast %110 : vector<1x16x128xbf16> to vector<16x128xbf16>
      %112 = vector.shape_cast %109 : vector<16x128xbf16> to vector<1x16x128xbf16>
      tpu.vector_store %arg14[%c4_94, %c0_95, %c0_96], %112 {strides = array<i32>} : memref<8x16x128xbf16, #tpu.memory_space<vmem>>, vector<1x16x128xbf16>,
      %c0_97 = arith.constant 0 : index
      %c0_98 = arith.constant 0 : index
      %c0_99 = arith.constant 0 : index
      %113 = vector.load %arg4[%c0_97, %c0_98, %c0_99] : memref<1x16x64xbf16, #tpu.memory_space<vmem>>, vector<1x16x64xbf16>
      %114 = vector.shape_cast %113 : vector<1x16x64xbf16> to vector<16x64xbf16>
      %c5 = arith.constant 5 : index
      %c0_100 = arith.constant 0 : index
      %c0_101 = arith.constant 0 : index
      %115 = vector.load %arg9[%c5, %c0_100, %c0_101] : memref<8x64x128xbf16, #tpu.memory_space<vmem>>, vector<1x64x128xbf16>
      %116 = vector.shape_cast %115 : vector<1x64x128xbf16> to vector<64x128xbf16>
      %cst_102 = arith.constant dense<0.000000e+00> : vector<16x128xf32>
      %117 = tpu.matmul %114, %116, %cst_102 {dimension_numbers = #tpu.dot_dimension_numbers<[1], [0], [0], [1], [0, 0, 1, 1], [], []>} : vector<16x64xbf16>, vector<64x128xbf16>, vector<16x128xf32> -> vector<16x128xf32>
      %c5_103 = arith.constant 5 : index
      %c0_104 = arith.constant 0 : index
      %c0_105 = arith.constant 0 : index
      %118 = vector.load %arg10[%c5_103, %c0_104, %c0_105] : memref<8x1x128xf32, #tpu.memory_space<vmem>>, vector<1x1x128xf32>
      %119 = vector.shape_cast %118 : vector<1x1x128xf32> to vector<1x128xf32>
      %120 = vector.broadcast %119 : vector<1x128xf32> to vector<16x128xf32>
      %121 = arith.addf %117, %120 : vector<16x128xf32>
      %122 = arith.truncf %121 : vector<16x128xf32> to vector<16x128xbf16>
      %c5_106 = arith.constant 5 : index
      %c0_107 = arith.constant 0 : index
      %c0_108 = arith.constant 0 : index
      %123 = vector.load %arg14[%c5_106, %c0_107, %c0_108] : memref<8x16x128xbf16, #tpu.memory_space<vmem>>, vector<1x16x128xbf16>
      %124 = vector.shape_cast %123 : vector<1x16x128xbf16> to vector<16x128xbf16>
      %125 = vector.shape_cast %122 : vector<16x128xbf16> to vector<1x16x128xbf16>
      tpu.vector_store %arg14[%c5_106, %c0_107, %c0_108], %125 {strides = array<i32>} : memref<8x16x128xbf16, #tpu.memory_space<vmem>>, vector<1x16x128xbf16>,
      %c0_109 = arith.constant 0 : index
      %c0_110 = arith.constant 0 : index
      %c0_111 = arith.constant 0 : index
      %126 = vector.load %arg4[%c0_109, %c0_110, %c0_111] : memref<1x16x64xbf16, #tpu.memory_space<vmem>>, vector<1x16x64xbf16>
      %127 = vector.shape_cast %126 : vector<1x16x64xbf16> to vector<16x64xbf16>
      %c6 = arith.constant 6 : index
      %c0_112 = arith.constant 0 : index
      %c0_113 = arith.constant 0 : index
      %128 = vector.load %arg9[%c6, %c0_112, %c0_113] : memref<8x64x128xbf16, #tpu.memory_space<vmem>>, vector<1x64x128xbf16>
      %129 = vector.shape_cast %128 : vector<1x64x128xbf16> to vector<64x128xbf16>
      %cst_114 = arith.constant dense<0.000000e+00> : vector<16x128xf32>
      %130 = tpu.matmul %127, %129, %cst_114 {dimension_numbers = #tpu.dot_dimension_numbers<[1], [0], [0], [1], [0, 0, 1, 1], [], []>} : vector<16x64xbf16>, vector<64x128xbf16>, vector<16x128xf32> -> vector<16x128xf32>
      %c6_115 = arith.constant 6 : index
      %c0_116 = arith.constant 0 : index
      %c0_117 = arith.constant 0 : index
      %131 = vector.load %arg10[%c6_115, %c0_116, %c0_117] : memref<8x1x128xf32, #tpu.memory_space<vmem>>, vector<1x1x128xf32>
      %132 = vector.shape_cast %131 : vector<1x1x128xf32> to vector<1x128xf32>
      %133 = vector.broadcast %132 : vector<1x128xf32> to vector<16x128xf32>
      %134 = arith.addf %130, %133 : vector<16x128xf32>
      %135 = arith.truncf %134 : vector<16x128xf32> to vector<16x128xbf16>
      %c6_118 = arith.constant 6 : index
      %c0_119 = arith.constant 0 : index
      %c0_120 = arith.constant 0 : index
      %136 = vector.load %arg14[%c6_118, %c0_119, %c0_120] : memref<8x16x128xbf16, #tpu.memory_space<vmem>>, vector<1x16x128xbf16>
      %137 = vector.shape_cast %136 : vector<1x16x128xbf16> to vector<16x128xbf16>
      %138 = vector.shape_cast %135 : vector<16x128xbf16> to vector<1x16x128xbf16>
      tpu.vector_store %arg14[%c6_118, %c0_119, %c0_120], %138 {strides = array<i32>} : memref<8x16x128xbf16, #tpu.memory_space<vmem>>, vector<1x16x128xbf16>,
      %c0_121 = arith.constant 0 : index
      %c0_122 = arith.constant 0 : index
      %c0_123 = arith.constant 0 : index
      %139 = vector.load %arg4[%c0_121, %c0_122, %c0_123] : memref<1x16x64xbf16, #tpu.memory_space<vmem>>, vector<1x16x64xbf16>
      %140 = vector.shape_cast %139 : vector<1x16x64xbf16> to vector<16x64xbf16>
      %c7 = arith.constant 7 : index
      %c0_124 = arith.constant 0 : index
      %c0_125 = arith.constant 0 : index
      %141 = vector.load %arg9[%c7, %c0_124, %c0_125] : memref<8x64x128xbf16, #tpu.memory_space<vmem>>, vector<1x64x128xbf16>
      %142 = vector.shape_cast %141 : vector<1x64x128xbf16> to vector<64x128xbf16>
      %cst_126 = arith.constant dense<0.000000e+00> : vector<16x128xf32>
      %143 = tpu.matmul %140, %142, %cst_126 {dimension_numbers = #tpu.dot_dimension_numbers<[1], [0], [0], [1], [0, 0, 1, 1], [], []>} : vector<16x64xbf16>, vector<64x128xbf16>, vector<16x128xf32> -> vector<16x128xf32>
      %c7_127 = arith.constant 7 : index
      %c0_128 = arith.constant 0 : index
      %c0_129 = arith.constant 0 : index
      %144 = vector.load %arg10[%c7_127, %c0_128, %c0_129] : memref<8x1x128xf32, #tpu.memory_space<vmem>>, vector<1x1x128xf32>
      %145 = vector.shape_cast %144 : vector<1x1x128xf32> to vector<1x128xf32>
      %146 = vector.broadcast %145 : vector<1x128xf32> to vector<16x128xf32>
      %147 = arith.addf %143, %146 : vector<16x128xf32>
      %148 = arith.truncf %147 : vector<16x128xf32> to vector<16x128xbf16>
      %c7_130 = arith.constant 7 : index
      %c0_131 = arith.constant 0 : index
      %c0_132 = arith.constant 0 : index
      %149 = vector.load %arg14[%c7_130, %c0_131, %c0_132] : memref<8x16x128xbf16, #tpu.memory_space<vmem>>, vector<1x16x128xbf16>
      %150 = vector.shape_cast %149 : vector<1x16x128xbf16> to vector<16x128xbf16>
      %151 = vector.shape_cast %148 : vector<16x128xbf16> to vector<1x16x128xbf16>
      tpu.vector_store %arg14[%c7_130, %c0_131, %c0_132], %151 {strides = array<i32>} : memref<8x16x128xbf16, #tpu.memory_space<vmem>>, vector<1x16x128xbf16>,
    } else {
    }
    %c0 = arith.constant 0 : index
    %c0_1 = arith.constant 0 : index
    %3 = vector.load %arg5[%c0, %c0_1] : memref<128x64xbf16, #tpu.memory_space<vmem>>, vector<128x64xbf16>
    %c0_2 = arith.constant 0 : index
    %c0_3 = arith.constant 0 : index
    %c0_4 = arith.constant 0 : index
    %4 = vector.load %arg2[%c0_2, %c0_3, %c0_4] : memref<1x16x64xbf16, #tpu.memory_space<vmem>>, vector<1x16x64xbf16>
    %5 = vector.shape_cast %4 : vector<1x16x64xbf16> to vector<16x64xbf16>
    %cst = arith.constant dense<0.000000e+00> : vector<128x16xf32>
    %6 = tpu.matmul %3, %5, %cst {dimension_numbers = #tpu.dot_dimension_numbers<[1], [1], [0], [0], [0, 0, 1, 0], [], []>} : vector<128x64xbf16>, vector<16x64xbf16>, vector<128x16xf32> -> vector<128x16xf32>
    %c0_5 = arith.constant 0 : index
    %c0_6 = arith.constant 0 : index
    %7 = vector.load %arg6[%c0_5, %c0_6] : memref<128x1xf32, #tpu.memory_space<vmem>>, vector<128x1xf32>
    %8 = vector.broadcast %7 : vector<128x1xf32> to vector<128x16xf32>
    %9 = arith.addf %6, %8 : vector<128x16xf32>
    %cst_7 = arith.constant 1.600000e+01 : f32
    %10 = math.sqrt %cst_7 : f32
    %cst_8 = arith.constant 1.000000e+00 : f32
    %11 = arith.divf %cst_8, %10 : f32
    %12 = vector.broadcast %11 : f32 to vector<128x16xf32>
    %13 = arith.mulf %9, %12 : vector<128x16xf32>
    %14 = arith.truncf %13 : vector<128x16xf32> to vector<128x16xbf16>
    %15 = vector.shape_cast %14 : vector<128x16xbf16> to vector<8x16x16xbf16>
    %c0_9 = arith.constant 0 : index
    %c0_10 = arith.constant 0 : index
    %c0_11 = arith.constant 0 : index
    %16 = vector.load %arg13[%c0_9, %c0_10, %c0_11] : memref<8x16x16xbf16, #tpu.memory_space<vmem>>, vector<8x16x16xbf16>
    %cst_12 = arith.constant dense<0.000000e+00> : vector<8x16x16xf32>
    %17 = tpu.matmul %15, %16, %cst_12 {dimension_numbers = #tpu.dot_dimension_numbers<[1], [1], [2], [2], [0, 0, 0, 2, 1, 2], [0], [0]>} : vector<8x16x16xbf16>, vector<8x16x16xbf16>, vector<8x16x16xf32> -> vector<8x16x16xf32>
    %cst_13 = arith.constant dense<0xFF800000> : vector<8x16xf32>
    %18 = vector.multi_reduction <maximumf>, %17, %cst_13 [2] : vector<8x16x16xf32> to vector<8x16xf32>
    %19 = vector.shape_cast %18 : vector<8x16xf32> to vector<8x16x1xf32>
    %20 = vector.broadcast %19 : vector<8x16x1xf32> to vector<8x16x16xf32>
    %21 = arith.subf %17, %20 : vector<8x16x16xf32>
    %22 = math.exp %21 : vector<8x16x16xf32>
    %cst_14 = arith.constant dense<0.000000e+00> : vector<8x16xf32>
    %23 = vector.multi_reduction <add>, %22, %cst_14 [2] : vector<8x16x16xf32> to vector<8x16xf32>
    %24 = vector.shape_cast %23 : vector<8x16xf32> to vector<8x16x1xf32>
    %25 = tpu.reciprocal %24 {approx = true} : vector<8x16x1xf32> -> vector<8x16x1xf32>
    %26 = vector.broadcast %25 : vector<8x16x1xf32> to vector<8x16x16xf32>
    %27 = arith.mulf %22, %26 : vector<8x16x16xf32>
    %28 = arith.truncf %27 : vector<8x16x16xf32> to vector<8x16x16xbf16>
    %c0_15 = arith.constant 0 : index
    %c0_16 = arith.constant 0 : index
    %c0_17 = arith.constant 0 : index
    %29 = vector.load %arg14[%c0_15, %c0_16, %c0_17] : memref<8x16x128xbf16, #tpu.memory_space<vmem>>, vector<8x16x128xbf16>
    %cst_18 = arith.constant dense<0.000000e+00> : vector<8x16x128xf32>
    %30 = tpu.matmul %28, %29, %cst_18 {dimension_numbers = #tpu.dot_dimension_numbers<[2], [1], [1], [2], [0, 0, 0, 1, 1, 2], [0], [0]>} : vector<8x16x16xbf16>, vector<8x16x128xbf16>, vector<8x16x128xf32> -> vector<8x16x128xf32>
    %cst_19 = arith.constant dense<0.000000e+00> : vector<16x128xf32>
    %31 = vector.multi_reduction <add>, %30, %cst_19 [0] : vector<8x16x128xf32> to vector<16x128xf32>
    %c0_20 = arith.constant 0 : index
    %c0_21 = arith.constant 0 : index
    %32 = vector.load %arg11[%c0_20, %c0_21] : memref<1x128xf32, #tpu.memory_space<vmem>>, vector<1x128xf32>
    %33 = vector.broadcast %32 : vector<1x128xf32> to vector<16x128xf32>
    %34 = arith.addf %31, %33 : vector<16x128xf32>
    %c0_22 = arith.constant 0 : index
    %c0_23 = arith.constant 0 : index
    %c0_24 = arith.constant 0 : index
    %35 = vector.load %arg12[%c0_22, %c0_23, %c0_24] : memref<1x16x128xf32, #tpu.memory_space<vmem>>, vector<1x16x128xf32>
    %36 = vector.shape_cast %35 : vector<1x16x128xf32> to vector<16x128xf32>
    %37 = vector.shape_cast %34 : vector<16x128xf32> to vector<1x16x128xf32>
    tpu.vector_store %arg12[%c0_22, %c0_23, %c0_24], %37 {strides = array<i32>} : memref<1x16x128xf32, #tpu.memory_space<vmem>>, vector<1x16x128xf32>,
    return
  }
  func.func @transform_0(%arg0: i32, %arg1: i32) -> (i32, i32, i32) {
    %c0_i32 = arith.constant 0 : i32
    %c0_i32_0 = arith.constant 0 : i32
    return %arg0, %arg1, %c0_i32 : i32, i32, i32
  }
  func.func @transform_1(%arg0: i32, %arg1: i32) -> (i32, i32, i32) {
    %c0_i32 = arith.constant 0 : i32
    %c0_i32_0 = arith.constant 0 : i32
    %c0_i32_1 = arith.constant 0 : i32
    return %arg0, %c0_i32, %c0_i32_0 : i32, i32, i32
  }
  func.func @transform_2(%arg0: i32, %arg1: i32) -> (i32, i32, i32) {
    %c0_i32 = arith.constant 0 : i32
    %c0_i32_0 = arith.constant 0 : i32
    %c0_i32_1 = arith.constant 0 : i32
    return %arg0, %c0_i32, %c0_i32_0 : i32, i32, i32
  }
  func.func @transform_3(%arg0: i32, %arg1: i32) -> (i32, i32) {
    %c0_i32 = arith.constant 0 : i32
    %c0_i32_0 = arith.constant 0 : i32
    %c0_i32_1 = arith.constant 0 : i32
    return %c0_i32, %c0_i32_0 : i32, i32
  }
  func.func @transform_4(%arg0: i32, %arg1: i32) -> (i32, i32) {
    %c0_i32 = arith.constant 0 : i32
    %c0_i32_0 = arith.constant 0 : i32
    %c0_i32_1 = arith.constant 0 : i32
    return %c0_i32, %c0_i32_0 : i32, i32
  }
  func.func @transform_5(%arg0: i32, %arg1: i32) -> (i32, i32) {
    %c0_i32 = arith.constant 0 : i32
    %c0_i32_0 = arith.constant 0 : i32
    %c0_i32_1 = arith.constant 0 : i32
    return %c0_i32, %c0_i32_0 : i32, i32
  }
  func.func @transform_6(%arg0: i32, %arg1: i32) -> (i32, i32) {
    %c0_i32 = arith.constant 0 : i32
    %c0_i32_0 = arith.constant 0 : i32
    %c0_i32_1 = arith.constant 0 : i32
    return %c0_i32, %c0_i32_0 : i32, i32
  }
  func.func @transform_7(%arg0: i32, %arg1: i32) -> (i32, i32, i32) {
    %c0_i32 = arith.constant 0 : i32
    %c0_i32_0 = arith.constant 0 : i32
    %c0_i32_1 = arith.constant 0 : i32
    %c0_i32_2 = arith.constant 0 : i32
    return %c0_i32, %c0_i32_0, %c0_i32_1 : i32, i32, i32
  }
  func.func @transform_8(%arg0: i32, %arg1: i32) -> (i32, i32, i32) {
    %c0_i32 = arith.constant 0 : i32
    %c0_i32_0 = arith.constant 0 : i32
    %c0_i32_1 = arith.constant 0 : i32
    %c0_i32_2 = arith.constant 0 : i32
    return %c0_i32, %c0_i32_0, %c0_i32_1 : i32, i32, i32
  }
  func.func @transform_9(%arg0: i32, %arg1: i32) -> (i32, i32) {
    %c0_i32 = arith.constant 0 : i32
    %c0_i32_0 = arith.constant 0 : i32
    %c0_i32_1 = arith.constant 0 : i32
    return %c0_i32, %c0_i32_0 : i32, i32
  }
  func.func @transform_10(%arg0: i32, %arg1: i32) -> (i32, i32, i32) {
    %c0_i32 = arith.constant 0 : i32
    %c0_i32_0 = arith.constant 0 : i32
    return %arg0, %arg1, %c0_i32 : i32, i32, i32
  }
}

</mosaic_0001>

<bundles_post_ra>
// kernel: tpu_custom_call.1
= control target key start
LH: loop header
LB: loop body
LE: loop exit
PB: predicated region body
PF: predicated region fallthrough
CT: control target
= control target key end

     0   :  { %s3912_s0 = inlined_call_operand.vmem [shape: bf16[2,16,64], index: 0, kind: input, shape index: {}]   ;;  %s3913_s1 = inlined_call_operand.vmem [shape: bf16[2,16,64], index: 1, kind: input, shape index: {}]   ;;  %s3914_s2 = inlined_call_operand.vmem [shape: bf16[2,16,64], index: 2, kind: input, shape index: {}]   ;;  %s3915_s3 = inlined_call_operand.vmem [shape: bf16[128,64], index: 3, kind: input, shape index: {}]   ;;  %s3916_s4 = inlined_call_operand.vmem [shape: f32[128,1], index: 4, kind: input, shape index: {}]   ;;  %s3917_s5 = inlined_call_operand.vmem [shape: bf16[128,64], index: 5, kind: input, shape index: {}]   ;;  %s3918_s6 = inlined_call_operand.vmem [shape: f32[128,1], index: 6, kind: input, shape index: {}]   ;;  %s3919_s7 = inlined_call_operand.vmem [shape: bf16[8,64,128], index: 7, kind: input, shape index: {}]   ;;  %s3920_s8 = inlined_call_operand.vmem [shape: f32[8,1,128], index: 8, kind: input, shape index: {}]   ;;  %s3921_s9 = inlined_call_operand.vmem [shape: f32[1,128], index: 9, kind: input, shape index: {}]   ;;  %s3922_s10 = inlined_call_operand.hbm [shape: f32[2,16,128], index: 10, kind: output, shape index: {}]  }
   0x1   :  { %3923 = sst [smem:[#allocation7_spill]] %s3912_s0 }
   0x2   :  { %3924 = sst [smem:[#allocation8_spill]] %s3913_s1 }
   0x3   :  { %15 = vsyncpa [#allocation5], 0 }
   0x4   :  { %17 = vsyncpa [#allocation5 + $0x1], 0  ;;  %s3274_s13 = smov 0   ;;  %s3276_s14 = smov 0  }
   0x5   :  { %s3278_s15 = smov 0   ;;  %s3280_s16 = smov 0  }
   0x6   :  { %s3282_s17 = smov 0   ;;  %s3284_s18 = smov 0  }
   0x7 LB: > { %s2462_s19 = sadd.s32 4294967295, %s3214_s18   ;;  %s2463_s20 = sadd.s32 4294967294, %s3214_s18   ;;  %s3214_s18 = sphi %s3284_s18, %s23_s18   ;;  %s3210_s17 = sphi %s3282_s17, %s3933_s17   ;;  %s3206_s16 = sphi %s3280_s16, %s3932_s16   ;;  %s3202_s15 = sphi %s3278_s15, %s3931_s15   ;;  %s3198_s14 = sphi %s3276_s14, %s3930_s14   ;;  %s3194_s13 = sphi %s3274_s13, %s3929_s13  }
   0x8   : > { %s35_s21 = sadd.s32 1, %s3210_s17  ;;  %s271_s22 = sadd.s32 1, %s3202_s15 }
   0x9   : > { %p37_p0 = scmp.ge.s32.totalorder %s35_s21, 2  ;;  %p281_p1 = scmp.ne.s32.totalorder %s3202_s15, %s3198_s14 }
   0xa   : > { %p282_p2 = scmp.eq.s32.totalorder %s2462_s19, 1  ;;  %p287_p3 = scmp.ne.s32.totalorder %s3198_s14, %s3194_s13 }
   0xb   : > { %s3935_s21 = smov (%p37_p0, %s35_s21), 0  ;;  %p288_p5 = scmp.eq.s32.totalorder %s2463_s20, 1 }
   0xc   : > { %p3314_p4 = por %p282_p2, %p281_p1  ;;  %s266_s24 = ssub.s32 %s3210_s17, %s3935_s21 }
   0xd   : > { %p2466_p6 = scmp.ge.s32.totalorder %s3214_s18, 1  ;;  %p269_p7 = scmp.eq.s32.totalorder %s266_s24, 0 }
   0xe   : > { %p3321_p8 = por %p288_p5, %p287_p3  ;;  %p356_p9 = scmp.lt.s32.totalorder %s3214_s18, 3 }
   0xf   : > { %s3327_s26 = scalar_select %p269_p7, %s3202_s15, %s271_s22  }
  0x10   : > { %p357_p10 = pnand %p2466_p6, %p356_p9 }
  0x11   : > { %p409_p11 = scmp.lt.s32.totalorder (!%p357_p10), %s3206_s16, 1  ;;  %s3927_s1 = sld [smem:[#allocation8_spill]] (!%p357_p10) }
  0x12   : > { %360 = sbr.rel (%p357_p10) target bundleno = 1060 (0x424), region = 60  ;;  %s3928_s0 = sld [smem:[#allocation7_spill]] (!%p357_p10) }
  0x13   : > { %s2955_s28 = sshll.u32 (!%p357_p10), %s3206_s16, 4 }
  0x14   : > { %s2349_s20 = scalar_lea.hbm (!%p357_p10), %s3922_s10, %s2955_s28 }
  0x17   : > { %v2904_v0 = vld [vmem:[%s3919_s7 + $0x58] sm:$0xff]  ;;  %v2903_v1 = vld [vmem:[%s3919_s7 + $0x50] sm:$0xff]  ;;  %s410_s11 = scalar_select %p409_p11, %s3206_s16, 1  ;;  %vm593_vm0 = vcmask 523264   ;;  %v2902_v3 = vld [vmem:[%s3919_s7 + $0x48] sm:$0xff]  ;;  %v3216_v10 = vmov 0  }
  0x18   : > { %886 = vmatpush.bf16.msra.mxu3 %v2904_v0  ;;  %v2901_v5 = vld [vmem:[%s3919_s7 + $0x40] sm:$0xff]  ;;  %v2919_v6 = vld [vmem:[%s3919_s7 + $0xb8] sm:$0xff]  ;;  %v2918_v9 = vld [vmem:[%s3919_s7 + $0xb0] sm:$0xff]  ;;  %3055 = vset.pattern.permute.xlu1 %v3216_v10  ;;  %vm686_vm1 = vcmask 125952   ;;  %vm1548_vm2 = vcmask 130048  }
  0x19   : > { %s3337_s12 = sshll.u32 %s410_s11, 3  ;;  %v2881_v7 = vld [vmem:[%s3917_s5] sm:$0xff]  ;;  %v454_v12 = vld [vmem:[%s3918_s6 + $0x10] sm:$0xff]  ;;  %3056 = vset.pattern.permute.xlu2 %v3216_v10  ;;  %v2917_v13 = vld [vmem:[%s3919_s7 + $0xa8] sm:$0xff]  ;;  %3054 = vset.pattern.permute.xlu0 %v3216_v10  ;;  %s3156_s11 = scalar_lea.hbm %s3922_s10, 32 }
  0x1a   : > { %s422_s22 = scalar_lea.vmem %s3927_s1, %s3337_s12  ;;  %s3351_s30 = scalar_lea.vmem %s3914_s2, %s3337_s12  ;;  %v1254_v11 = vld [vmem:[%s3916_s4] sm:$0xff]  ;;  %480 = vperm.xlu2 %3056, %v454_v12   ;;  %v1255_v16 = vld [vmem:[%s3916_s4 + $0x8] sm:$0xff]  ;;  %v1261_v20 = vld [vmem:[%s3916_s4 + $0x38] sm:$0xff] }
  0x1b   : > { %v2889_v2 = vld [vmem:[%s422_s22] sm:$0xff]  ;;  %s416_s1 = scalar_lea.vmem %s3928_s0, %s3337_s12  ;;  %1272 = vperm.xlu1 %3055, %v1254_v11   ;;  %v2882_v18 = vld [vmem:[%s3917_s5 + $0x8] sm:$0xff]  ;;  %v455_v21 = vld [vmem:[%s3918_s6 + $0x18] sm:$0xff]  ;;  %s405_s12 = sand.u32 1, %s3198_s14  }
  0x1c   : > { %887 = vmatpush.bf16.msra.mxu3 %v2903_v1  ;;  %v619_v4 = vsel %vm593_vm0, %v2889_v2, 0  ;;  %v2900_v8 = vld [vmem:[%s3351_s30] sm:$0xff]  ;;  %v1256_v22 = vld [vmem:[%s3916_s4 + $0x10] sm:$0xff]  ;;  %v1257_v27 = vld [vmem:[%s3916_s4 + $0x18] sm:$0xff]  ;;  %s2467_s24 = sshll.u32 %s405_s12, 4  ;;  %s2336_s16 = scalar_lea.sflag [#allocation5], %s405_s12 }
  0x1d   : > { %628 = vmatpush.bf16.xpose.msra.mxu0 %v619_v4  ;;  %v2938_v14 = vld [vmem:[%s416_s1] sm:$0xff]  ;;  %1282 = vperm.xlu0 %3054, %v1256_v22   ;;  %v2883_v25 = vld [vmem:[%s3917_s5 + $0x10] sm:$0xff]  ;;  %v459_v28 = vld [vmem:[%s3918_s6 + $0x38] sm:$0xff]  ;;  %s407_s29 = scalar_lea.vmem [#allocation4], %s2467_s24 }
  0x1e   : > { %v2916_v15 = vld [vmem:[%s3919_s7 + $0xa0] sm:$0xff]  ;;  %v1421_v17 = vsel %vm593_vm0, %v2938_v14, 0  ;;  %v1259_v29 = vld [vmem:[%s3916_s4 + $0x28] sm:$0xff]  ;;  %v1260_v30 = vld [vmem:[%s3916_s4 + $0x30] sm:$0xff]  ;;  %s2350_s22 = sshll.u32 %s407_s29, 4  ;;  %s2351_s22 = int_to_ptr.vmem [resolvable:$true] %s2350_s22 }
  0x1f   : > { %v2915_v19 = vld [vmem:[%s3351_s30] sm:$0xff]  ;;  %v1264_v32 = vld [vmem:[%s3916_s4 + $0x50] sm:$0xff]  ;;  %v2884_v33 = vld [vmem:[%s3917_s5 + $0x18] sm:$0xff] }
  0x20   : > { %888 = vmatpush.bf16.msra.mxu3 %v2902_v3  ;;  %v1258_v23 = vld [vmem:[%s3916_s4 + $0x20] sm:$0xff]  ;;  %v2931_v34 = vld [vmem:[%s3915_s3 + $0x8] sm:$0xff]  ;;  %v1268_v38 = vld [vmem:[%s3916_s4 + $0x70] sm:$0xff] }
  0x21   : > { %v452_v24 = vld [vmem:[%s3918_s6] sm:$0xff]  ;;  %v1263_v35 = vld [vmem:[%s3916_s4 + $0x48] sm:$0xff]  ;;  %v458_v39 = vld [vmem:[%s3918_s6 + $0x30] sm:$0xff] }
  0x22   : > { %485 = vperm.xlu2 %3056, %v455_v21   ;;  %v2930_v26 = vld [vmem:[%s3915_s3] sm:$0xff]  ;;  %v453_v36 = vld [vmem:[%s3918_s6 + $0x8] sm:$0xff]  ;;  %v462_v40 = vld [vmem:[%s3918_s6 + $0x50] sm:$0xff] }
  0x23   : > { %1277 = vperm.xlu1 %3055, %v1255_v16   ;;  %v456_v31 = vld [vmem:[%s3918_s6 + $0x20] sm:$0xff]  ;;  %v457_v37 = vld [vmem:[%s3918_s6 + $0x28] sm:$0xff]  ;;  %v2932_v42 = vld [vmem:[%s3915_s3 + $0x10] sm:$0xff] }
  0x24   : > { %889 = vmatpush.bf16.msra.mxu3 %v2901_v5  ;;  %2510 = vmatmul.msk.bf16.vlgmr.msra.gmra.mxu0 %vm593_vm0, %v2881_v7  ;;  %v2885_v41 = vld [vmem:[%s3917_s5 + $0x20] sm:$0xff]  ;;  %v1265_v44 = vld [vmem:[%s3916_s4 + $0x58] sm:$0xff]  ;;  %v461_v48 = vld [vmem:[%s3918_s6 + $0x48] sm:$0xff] }
  0x25   : > { %1287 = vperm.xlu0 %3054, %v1257_v27   ;;  %v460_v43 = vld [vmem:[%s3918_s6 + $0x40] sm:$0xff]  ;;  %v1269_v45 = vld [vmem:[%s3916_s4 + $0x78] sm:$0xff]  ;;  %v2886_v49 = vld [vmem:[%s3917_s5 + $0x28] sm:$0xff] }
  0x26   : > { %v1266_v46 = vld [vmem:[%s3916_s4 + $0x60] sm:$0xff]  ;;  %v2933_v50 = vld [vmem:[%s3915_s3 + $0x18] sm:$0xff]  ;;  %v466_v51 = vld [vmem:[%s3918_s6 + $0x70] sm:$0xff] }
  0x27   : > { %2598 = vmatmul.msk.bf16.vlgmr.msra.gmra.mxu3 %vm593_vm0, %v2900_v8  ;;  %v1262_v47 = vld [vmem:[%s3916_s4 + $0x40] sm:$0xff]  ;;  %v463_v52 = vld [vmem:[%s3918_s6 + $0x58] sm:$0xff]  ;;  %v1267_v53 = vld [vmem:[%s3916_s4 + $0x68] sm:$0xff] }
  0x28   : > { %1087 = vmatpush.bf16.msrb.mxu3 %v2919_v6  ;;  %v467_v54 = vld [vmem:[%s3918_s6 + $0x78] sm:$0xff]  ;;  %v2887_v55 = vld [vmem:[%s3917_s5 + $0x30] sm:$0xff]  ;;  %v2934_v56 = vld [vmem:[%s3915_s3 + $0x20] sm:$0xff] }
  0x29   : > { %v464_v57 = vld [vmem:[%s3918_s6 + $0x60] sm:$0xff]  ;;  %v465_v58 = vld [vmem:[%s3918_s6 + $0x68] sm:$0xff]  ;;  %v2888_v60 = vld [vmem:[%s3917_s5 + $0x38] sm:$0xff] }
  0x2a   : > { %470 = vperm.xlu2 %3056, %v452_v24   ;;  %v2935_v61 = vld [vmem:[%s3915_s3 + $0x28] sm:$0xff]  ;;  %v2936_v2 = vld [vmem:[%s3915_s3 + $0x30] sm:$0xff]  ;;  %v3063_v10 = vld [vmem:[%s3920_s8 + $0x2] ss:$0 sm:$0xff] }
  0x2b   : > { %1307 = vperm.xlu1 %3055, %v1261_v20  }
  0x2c   : > { %1088 = vmatpush.bf16.msrb.mxu3 %v2918_v9 }
  0x2d   : > { %1302 = vperm.xlu0 %3054, %v1260_v30  }
  0x30   : > { %1089 = vmatpush.bf16.msrb.mxu3 %v2917_v13 }
  0x32   : > { %1297 = vperm.xlu2 %3056, %v1259_v29   ;;  %v3064_v29 = vld [vmem:[%s3920_s8 + $0x5] ss:$0 sm:$0xff] }
  0x33   : > { %1292 = vperm.xlu1 %3055, %v1258_v23  }
  0x34   : > { %1090 = vmatpush.bf16.msrb.mxu3 %v2916_v15  ;;  %2511 = vmatmul.msk.bf16.gmra.mxu0 %vm593_vm0, %v2882_v18 }
  0x35   : > { %475 = vperm.xlu0 %3054, %v453_v36  }
  0x37   : > { %2688 = vmatmul.msk.bf16.vlgmr.msrb.gmra.mxu3 %vm593_vm0, %v2915_v19 }
  0x38   : > { %1430 = vmatpush.bf16.xpose.msra.mxu3 %v1421_v17  ;;  %v2937_v17 = vld [vmem:[%s3915_s3 + $0x38] sm:$0xff] }
  0x3a   : > { %1322 = vperm.xlu2 %3056, %v1264_v32  }
  0x3b   : > { %505 = vperm.xlu1 %3055, %v459_v28  }
  0x3d   : > { %500 = vperm.xlu0 %3054, %v458_v39  }
  0x42   : > { %495 = vperm.xlu2 %3056, %v457_v37  }
  0x43   : > { %490 = vperm.xlu1 %3055, %v456_v31  }
  0x44   : > { %2512 = vmatmul.msk.bf16.gmra.mxu0 %vm593_vm0, %v2883_v25 }
  0x45   : > { %1327 = vperm.xlu0 %3054, %v1265_v44  }
  0x47   : > { %2785 = vmatmul.msk.bf16.vlgmr.msra.gmra.mxu3 %vm593_vm0, %v2930_v26 }
  0x4a   : > { %520 = vperm.xlu2 %3056, %v462_v40   ;;  %v2894_v40 = vld [vmem:[%s3919_s7 + $0x18] sm:$0xff] }
  0x4b   : > { %1317 = vperm.xlu1 %3055, %v1263_v35   ;;  %753 = vmatpush.bf16.msra.mxu1 %v2894_v40  ;;  %v2924_v40 = vld [vmem:[%s3919_s7 + $0xd8] sm:$0xff] }
  0x4d   : > { %1312 = vperm.xlu0 %3054, %v1262_v47   ;;  %v2898_v47 = vld [vmem:[%s3919_s7 + $0x30] sm:$0xff] }
  0x52   : > { %1347 = vperm.xlu2 %3056, %v1269_v45  }
  0x53   : > { %1342 = vperm.xlu1 %3055, %v1268_v38  }
  0x54   : > { %2513 = vmatmul.msk.bf16.gmra.mxu0 %vm593_vm0, %v2884_v33 }
  0x55   : > { %525 = vperm.xlu0 %3054, %v463_v52  }
  0x57   : > { %2786 = vmatmul.msk.bf16.gmra.mxu3 %vm593_vm0, %v2931_v34 }
  0x5a   : > { %515 = vperm.xlu2 %3056, %v461_v48  }
  0x5b   : > { %510 = vperm.xlu1 %3055, %v460_v43  }
  0x62   : > { %1337 = vperm.xlu2 %3056, %v1267_v53  }
  0x63   : > { %1332 = vperm.xlu1 %3055, %v1266_v46   ;;  %v2893_v46 = vld [vmem:[%s3919_s7 + $0x10] sm:$0xff] }
  0x64   : > { %2514 = vmatmul.msk.bf16.gmra.mxu0 %vm593_vm0, %v2885_v41  ;;  %v2899_v41 = vld [vmem:[%s3919_s7 + $0x38] sm:$0xff]  ;;  %754 = vmatpush.bf16.msra.mxu1 %v2893_v46 }
  0x65   : > { %819 = vmatpush.bf16.msra.mxu2 %v2899_v41 }
  0x67   : > { %2787 = vmatmul.msk.bf16.gmra.mxu3 %vm593_vm0, %v2932_v42 }
  0x69   : > { %820 = vmatpush.bf16.msra.mxu2 %v2898_v47 }
  0x6a   : > { %545 = vperm.xlu2 %3056, %v467_v54   ;;  %v2892_v54 = vld [vmem:[%s3919_s7 + $0x8] sm:$0xff] }
  0x6b   : > { %540 = vperm.xlu1 %3055, %v466_v51   ;;  %755 = vmatpush.bf16.msra.mxu1 %v2892_v54 }
  0x72   : > { %530 = vperm.xlu2 %3056, %v464_v57  }
  0x74   : > { %2515 = vmatmul.msk.bf16.gmra.mxu0 %vm593_vm0, %v2886_v49  ;;  %v481_v59 = vpop.permute.xlu2 %480 }
  0x77   : > { %2788 = vmatmul.msk.bf16.gmra.mxu3 %vm593_vm0, %v2933_v50 }
  0x7a   : > { %535 = vperm.xlu2 %3056, %v465_v58  }
  0x7c   : > { %v486_v62 = vpop.permute.xlu2 %485 }
  0x84   : > { %2516 = vmatmul.msk.bf16.gmra.mxu0 %vm593_vm0, %v2887_v55  ;;  %v471_v3 = vpop.permute.xlu2 %470  ;;  %v2897_v55 = vld [vmem:[%s3919_s7 + $0x28] sm:$0xff] }
  0x85   : > { %821 = vmatpush.bf16.msra.mxu2 %v2897_v55 }
  0x87   : > { %2789 = vmatmul.msk.bf16.gmra.mxu3 %vm593_vm0, %v2934_v56 }
  0x8c   : > { %v3540_v9 = vpop.permute.xlu2 %1297 }
  0x8d   : > { %v3529_v63 = vpop.permute.xlu1 %1272 }
  0x8f   : > { %v3545_v11 = vpop.permute.xlu0 %1282 }
  0x94   : > { %2517 = vmatmul.msk.bf16.gmra.mxu0 %vm593_vm0, %v2888_v60  ;;  %v3553_v21 = vpop.permute.xlu2 %1322  ;;  %v2896_v60 = vld [vmem:[%s3919_s7 + $0x20] sm:$0xff] }
  0x95   : > { %v3531_v0 = vpop.permute.xlu1 %1277  ;;  %822 = vmatpush.bf16.msra.mxu2 %v2896_v60  ;;  %v2927_v60 = vld [vmem:[%s3919_s7 + $0xe8] sm:$0xff] }
  0x97   : > { %2790 = vmatmul.msk.bf16.gmra.mxu3 %vm593_vm0, %v2935_v61  ;;  %v3556_v23 = vpop.permute.xlu0 %1287 }
  0x9c   : > { %v496_v30 = vpop.permute.xlu2 %495 }
  0x9d   : > { %v3538_v7 = vpop.permute.xlu1 %1307 }
  0x9f   : > { %v3564_v32 = vpop.permute.xlu0 %1302 }
  0xa1   : > { %v630_v1 = vpop.f32.mrf.mxu0 }
  0xa2   : > { %v631_v4 = vadd.f32 %v630_v1, %v471_v3  ;;  %v2890_v1 = vld [vmem:[%s3351_s30] sm:$0xff] }
  0xa4   : > { %v670_v5 = vpack.c.bf16 %v631_v4, %v631_v4  ;;  %v3579_v49 = vpop.permute.xlu2 %520  ;;  %v2909_v4 = vld [vmem:[%s3919_s7 + $0x78] sm:$0xff] }
  0xa5   : > { %v3547_v13 = vpop.permute.xlu1 %1292 }
  0xa6   : > { %687 = vst.msk [vmem:[#allocation2] sm:$0xf] %vm686_vm1, %v670_v5  ;;  %v2914_v5 = vld [vmem:[%s3919_s7 + $0x98] sm:$0xff] }
  0xa7   : > { %2791 = vmatmul.msk.bf16.gmra.mxu3 %vm593_vm0, %v2936_v2  ;;  %v476_v43 = vpop.permute.xlu0 %475  ;;  %v2895_v2 = vld [vmem:[%s3351_s30] sm:$0xff]  ;;  %1020 = vmatpush.bf16.msrb.mxu2 %v2914_v5 }
  0xa8   : > { %2568 = vmatmul.msk.bf16.vlgmr.msra.gmra.mxu2 %vm593_vm0, %v2895_v2  ;;  %v2926_v2 = vld [vmem:[%s3919_s7 + $0xe0] sm:$0xff] }
  0xa9   : > { %v632_v8 = vpop.f32.mrf.mxu0 }
  0xaa   : > { %v891_v6 = vpop.f32.mrf.mxu3  ;;  %v633_v45 = vadd.f32 %v632_v8, %v476_v43  ;;  %v2929_v43 = vld [vmem:[%s3919_s7 + $0xf8] sm:$0xff] }
  0xab   : > { %v892_v14 = vadd.f32 %v3063_v10, %v891_v6 }
  0xac   : > { %v671_v50 = vpack.c.bf16 %v633_v45, %v633_v45  ;;  %v3599_v3 = vpop.permute.xlu2 %1347 }
  0xad   : > { %v3558_v25 = vpop.permute.xlu1 %505 }
  0xae   : > { %688 = vst.msk [vmem:[#allocation2 + $0x4] sm:$0xf] %vm686_vm1, %v671_v50  ;;  %v2928_v50 = vld [vmem:[%s3919_s7 + $0xf0] sm:$0xff] }
  0xaf   : > { %v501_v58 = vpop.permute.xlu0 %500 }
  0xb1   : > { %v635_v16 = vpop.f32.mrf.mxu0 }
  0xb2   : > { %v893_v12 = vpop.f32.mrf.mxu3  ;;  %v636_v18 = vadd.f32 %v635_v16, %v481_v59  ;;  %v2891_v59 = vld [vmem:[%s3919_s7] sm:$0xff] }
  0xb3   : > { %v894_v15 = vadd.f32 %v3063_v10, %v893_v12  ;;  %756 = vmatpush.bf16.msra.mxu1 %v2891_v59  ;;  %v2922_v59 = vld [vmem:[%s3919_s7 + $0xc8] sm:$0xff] }
  0xb4   : > { %v672_v20 = vpack.c.bf16 %v636_v18, %v636_v18 }
  0xb5   : > { %v2969_v19 = vpack.c.bf16 %v894_v15, %v892_v14  ;;  %v491_v36 = vpop.permute.xlu1 %490  ;;  %v2908_v14 = vld [vmem:[%s3919_s7 + $0x70] sm:$0xff] }
  0xb6   : > { %689 = vst.msk [vmem:[#allocation2 + $0x8] sm:$0xf] %vm686_vm1, %v672_v20  ;;  %2538 = vmatmul.msk.bf16.vlgmr.msra.gmra.mxu1 %vm593_vm0, %v2890_v1  ;;  %v2913_v15 = vld [vmem:[%s3919_s7 + $0x90] sm:$0xff] }
  0xb7   : > { %2970 = vst [vmem:[#allocation3 + $0x18] sm:$0xff] %v2969_v19   ;;  %2792 = vmatmul.msk.bf16.gmra.mxu3 %vm593_vm0, %v2937_v17  ;;  %953 = vmatpush.bf16.msrb.mxu1 %v2909_v4 }
  0xb8   : > { %1021 = vmatpush.bf16.msrb.mxu2 %v2913_v15  ;;  %v2939_v15 = vld [vmem:[#allocation2] sm:$0xff] }
  0xb9   : > { %v637_v24 = vpop.f32.mrf.mxu0 }
  0xba   : > { %v1092_v22 = vpop.f32.mrf.mxu3  ;;  %v638_v26 = vadd.f32 %v637_v24, %v486_v62 }
  0xbb   : > { %v1093_v33 = vadd.f32 %v3064_v29, %v1092_v22  ;;  %954 = vmatpush.bf16.msrb.mxu1 %v2908_v14  ;;  %v2912_v22 = vld [vmem:[%s3919_s7 + $0x88] sm:$0xff] }
  0xbc   : > { %v673_v27 = vpack.c.bf16 %v638_v26, %v638_v26  ;;  %v516_v26 = vpop.permute.xlu2 %515  ;;  %1022 = vmatpush.bf16.msrb.mxu2 %v2912_v22 }
  0xbd   : > { %v3581_v53 = vpop.permute.xlu1 %1317 }
  0xbe   : > { %v2949_v28 = vld [vmem:[#allocation3 + $0x18] sm:$0xff]  ;;  %690 = vst.msk [vmem:[#allocation2 + $0xc] sm:$0xf] %vm686_vm1, %v673_v27 }
  0xbf   : > { %2166 = vmatpush.bf16.msrb.mxu0 %v2949_v28 }
  0xc1   : > { %v640_v35 = vpop.f32.mrf.mxu0 }
  0xc2   : > { %v1094_v31 = vpop.f32.mrf.mxu3  ;;  %v641_v37 = vadd.f32 %v640_v35, %v491_v36 }
  0xc3   : > { %v1095_v34 = vadd.f32 %v3064_v29, %v1094_v31  ;;  %v2911_v31 = vld [vmem:[%s3919_s7 + $0x80] sm:$0xff] }
  0xc4   : > { %v674_v39 = vpack.c.bf16 %v641_v37, %v641_v37  ;;  %v3636_v37 = vpop.permute.xlu0 %1327  ;;  %1023 = vmatpush.bf16.msrb.mxu2 %v2911_v31  ;;  %v3655_v55 = vpop.permute.xlu2 %1337 }
  0xc5   : > { %v2984_v38 = vpack.c.bf16 %v1095_v34, %v1093_v33  ;;  %v3610_v6 = vpop.permute.xlu1 %1342 }
  0xc6   : > { %691 = vst.msk [vmem:[#allocation2 + $0x10] sm:$0xf] %vm686_vm1, %v674_v39  ;;  %v2910_v39 = vld [vmem:[%s3351_s30] sm:$0xff] }
  0xc7   : > { %2985 = vst [vmem:[#allocation3 + $0x20] sm:$0xff] %v2984_v38   ;;  %2658 = vmatmul.msk.bf16.vlgmr.msrb.gmra.mxu2 %vm593_vm0, %v2910_v39 }
  0xc8   : > { %1221 = vmatpush.bf16.msra.mxu2 %v2929_v43 }
  0xc9   : > { %v642_v44 = vpop.f32.mrf.mxu0 }
  0xca   : > { %v1432_v42 = vpop.f32.mrf.mxu3  ;;  %v643_v48 = vadd.f32 %v642_v44, %v496_v30  ;;  %v2906_v30 = vld [vmem:[%s3919_s7 + $0x60] sm:$0xff] }
  0xcb   : > { %v1433_v17 = vadd.f32 %v1432_v42, %v3529_v63 }
  0xcc   : > { %v675_v52 = vpack.c.bf16 %v643_v48, %v643_v48  ;;  %v2923_v48 = vld [vmem:[%s3919_s7 + $0xd0] sm:$0xff]  ;;  %1222 = vmatpush.bf16.msra.mxu2 %v2928_v50  ;;  %v3673_v14 = vpop.permute.xlu2 %545 }
  0xcd   : > { %v1472_v24 = vmul.f32 0.25, %v1433_v17  ;;  %v511_v29 = vpop.permute.xlu1 %510 }
  0xce   : > { %v2952_v51 = vld [vmem:[#allocation3 + $0x20] sm:$0xff]  ;;  %692 = vst.msk [vmem:[#allocation2 + $0x14] sm:$0xf] %vm686_vm1, %v675_v52 }
  0xcf   : > { %2250 = vmatpush.bf16.msra.mxu0 %v2952_v51  ;;  %v1488_v34 = vpack.c.bf16 %v1472_v24, %v1472_v24 }
  0xd0   : > { %1223 = vmatpush.bf16.msra.mxu2 %v2927_v60 }
  0xd1   : > { %v645_v57 = vpop.f32.mrf.mxu0  ;;  %v1522_v44 = vunpack.c.l.b16 %v1488_v34 }
  0xd2   : > { %v1434_v56 = vpop.f32.mrf.mxu3  ;;  %v646_v61 = vadd.f32 %v645_v57, %v501_v58 }
  0xd3   : > { %v1435_v10 = vadd.f32 %v1434_v56, %v3531_v0  ;;  %v2907_v0 = vld [vmem:[%s3919_s7 + $0x68] sm:$0xff] }
  0xd4   : > { %v676_v62 = vpack.c.bf16 %v646_v61, %v646_v61  ;;  %955 = vmatpush.bf16.msrb.mxu1 %v2907_v0  ;;  %v1313_v61 = vpop.permute.xlu0 %1312  ;;  %1224 = vmatpush.bf16.msra.mxu2 %v2926_v2 }
  0xd5   : > { %v1473_v20 = vmul.f32 0.25, %v1435_v10 }
  0xd6   : > { %693 = vst.msk [vmem:[#allocation2 + $0x18] sm:$0xf] %vm686_vm1, %v676_v62 }
  0xd8   : > { %956 = vmatpush.bf16.msrb.mxu1 %v2906_v30 }
  0xd9   : > { %v647_v12 = vpop.f32.mrf.mxu0 }
  0xda   : > { %v1437_v8 = vpop.f32.mrf.mxu3  ;;  %v648_v16 = vadd.f32 %v647_v12, %v3558_v25 }
  0xdb   : > { %v1438_v18 = vadd.f32 %v1437_v8, %v3545_v11  ;;  %v1489_v11 = vpack.c.bf16 %v1473_v20, %v1473_v20  ;;  %v2941_v20 = vld [vmem:[#allocation2 + $0x10] sm:$0xff] }
  0xdc   : > { %v677_v19 = vpack.c.bf16 %v648_v16, %v648_v16  ;;  %1154 = vmatpush.bf16.msra.mxu1 %v2924_v40  ;;  %v2940_v16 = vld [vmem:[#allocation2 + $0x8] sm:$0xff]  ;;  %v526_v24 = vpop.permute.xlu0 %525 }
  0xdd   : > { %v1474_v25 = vmul.f32 0.25, %v1438_v18  ;;  %v1523_v41 = vunpack.c.l.b16 %v1489_v11  ;;  %v2920_v18 = vld [vmem:[%s3351_s30] sm:$0xff]  ;;  %1604 = vmatpush.bf16.msrb.mxu2 %v2940_v16 }
  0xde   : > { %694 = vst.msk [vmem:[#allocation2 + $0x1c] sm:$0xf] %vm686_vm1, %v677_v19  ;;  %v2925_v19 = vld [vmem:[%s3351_s30] sm:$0xff] }
  0xdf   : > { %v1490_v35 = vpack.c.bf16 %v1474_v25, %v1474_v25  ;;  %v1524_v51 = vpack.c.b16 %v1523_v41, %v1522_v44  ;;  %2748 = vmatmul.msk.bf16.vlgmr.msra.gmra.mxu2 %vm593_vm0, %v2925_v19  ;;  %v1333_v41 = vpop.permute.xlu1 %1332 }
  0xe0   : > { %1155 = vmatpush.bf16.msra.mxu1 %v2923_v48 }
  0xe1   : > { %v650_v28 = vpop.f32.mrf.mxu0  ;;  %v1568_v45 = vunpack.c.l.b16 %v1490_v35 }
  0xe2   : > { %v1439_v63 = vpop.f32.mrf.mxu3  ;;  %v651_v33 = vadd.f32 %v650_v28, %v511_v29  ;;  %v531_v29 = vpop.permute.xlu2 %530 }
  0xe3   : > { %v1440_v27 = vadd.f32 %v1439_v63, %v3556_v23  ;;  %v2905_v23 = vld [vmem:[%s3351_s30] sm:$0xff]  ;;  %s2352_s30 = sshll.u32 %s2349_s20, 4  ;;  %s2353_s30 = int_to_ptr.hbm [resolvable:$true] %s2352_s30 }
  0xe4   : > { %v678_v38 = vpack.c.bf16 %v651_v33, %v651_v33  ;;  %2628 = vmatmul.msk.bf16.vlgmr.msrb.gmra.mxu1 %vm593_vm0, %v2905_v23  ;;  %s3150_s1 = sshra.s32 %s2353_s30, 4  ;;  %s3151_s1 = int_to_ptr.hbm [resolvable:$true] %s3150_s1 }
  0xe5   : > { %v1475_v36 = vmul.f32 0.25, %v1440_v27  ;;  %1156 = vmatpush.bf16.msra.mxu1 %v2922_v59  ;;  %v2942_v22 = vld [vmem:[#allocation2 + $0x18] sm:$0xff]  ;;  %s3152_s24 = scalar_lea.hbm %s3151_s1, 16  ;;  %p3157_p1 = scmp.lt.s32.totalorder %s3151_s1, %s3922_s10 }
  0xe6   : > { %695 = vst.msk [vmem:[#allocation2 + $0x20] sm:$0xf] %vm686_vm1, %v678_v38  ;;  %1694 = vmatpush.bf16.msra.mxu2 %v2942_v22  ;;  %p3153_p12 = scmp.ne.s32.totalorder %s3151_s1, %s3152_s24  ;;  %p3158_p2 = scmp.lt.s32.totalorder %s3156_s11, %s3152_s24 }
  0xe7   : > { %v1491_v42 = vpack.c.bf16 %v1475_v36, %v1475_v36 }
  0xe8   : > { %p3154_p13 = pnand %p3153_p12, %p3314_p4  ;;  %p3159_p3 = por %p3158_p2, %p3157_p1 }
  0xe9   : > { %v1569_v46 = vunpack.c.l.b16 %v1491_v42  ;;  %v652_v54 = vpop.f32.mrf.mxu0 }
  0xea   : > { %v1442_v47 = vpop.f32.mrf.mxu3  ;;  %v653_v56 = vadd.f32 %v652_v54, %v516_v26  ;;  %p3155_p0 = pneg %p3154_p13 }
  0xeb   : > { %v1570_v52 = vpack.c.b16 %v1569_v46, %v1568_v45  ;;  %v1443_v57 = vadd.f32 %v1442_v47, %v3547_v13  ;;  %v2921_v13 = vld [vmem:[%s3919_s7 + $0xc0] sm:$0xff] }
  0xec   : > { %v679_v58 = vpack.c.bf16 %v653_v56, %v653_v56  ;;  %1157 = vmatpush.bf16.msra.mxu1 %v2921_v13  ;;  %p3160_p5 = pnand %p3159_p3, %p3155_p0 }
  0xed   : > { %3057 = vxpose.binary.xlu0.c.b16.start.end [1/2] (short) (narrow) %v1524_v51, %v1570_v52, 16  ;;  %v1476_v62 = vmul.f32 0.25, %v1443_v57  ;;  %v541_v51 = vpop.permute.xlu1 %540 }
  0xee   : > { %696 = vst.msk [vmem:[#allocation2 + $0x24] sm:$0xf] %vm686_vm1, %v679_v58 }
  0xef   : > { %v1492_v10 = vpack.c.bf16 %v1476_v62, %v1476_v62 }
  0xf0   : > { %1559 = vmatpush.bf16.msrb.mxu1 %v2939_v15 }
  0xf1   : > { %v655_v5 = vpop.f32.mrf.mxu0 }
  0xf2   : > { %v1444_v1 = vpop.f32.mrf.mxu3  ;;  %v656_v8 = vadd.f32 %v655_v5, %v3579_v49 }
  0xf3   : > { %v1445_v4 = vadd.f32 %v1444_v1, %v3540_v9  ;;  %v1613_v9 = vunpack.c.l.b16 %v1492_v10 }
  0xf4   : > { %v680_v17 = vpack.c.bf16 %v656_v8, %v656_v8  ;;  %2718 = vmatmul.msk.bf16.vlgmr.msra.gmra.mxu1 %vm593_vm0, %v2920_v18 }
  0xf5   : > { %v1477_v12 = vmul.f32 0.25, %v1445_v4  ;;  %1649 = vmatpush.bf16.msra.mxu1 %v2941_v20 }
  0xf6   : > { %697 = vst.msk [vmem:[#allocation2 + $0x28] sm:$0xf] %vm686_vm1, %v680_v17 }
  0xf7   : > { %v1493_v0 = vpack.c.bf16 %v1477_v12, %v1477_v12 }
  0xf9   : > { %v1614_v49 = vunpack.c.l.b16 %v1493_v0  ;;  %v657_v63 = vpop.f32.mrf.mxu0 }
  0xfa   : > { %v1447_v25 = vpop.f32.mrf.mxu3  ;;  %v658_v11 = vadd.f32 %v657_v63, %v526_v24 }
  0xfb   : > { %v1615_v26 = vpack.c.b16 %v1614_v49, %v1613_v9  ;;  %v1448_v27 = vadd.f32 %v1447_v25, %v3564_v32  ;;  %v536_v32 = vpop.permute.xlu2 %535 }
  0xfc   : > { %v681_v28 = vpack.c.bf16 %v658_v11, %v658_v11 }
  0xfd   : > { %v1478_v30 = vmul.f32 0.25, %v1448_v27 }
  0xfe   : > { %698 = vst.msk [vmem:[#allocation2 + $0x2c] sm:$0xf] %vm686_vm1, %v681_v28 }
  0xff   : > { %v1494_v36 = vpack.c.bf16 %v1478_v30, %v1478_v30 }
 0x101   : > { %v660_v34 = vpop.f32.mrf.mxu0  ;;  %v1658_v40 = vunpack.c.l.b16 %v1494_v36 }
 0x102   : > { %v1449_v31 = vpop.f32.mrf.mxu3  ;;  %v661_v35 = vadd.f32 %v660_v34, %v531_v29 }
 0x103   : > { %v1450_v33 = vadd.f32 %v1449_v31, %v3538_v7 }
 0x104   : > { %v682_v23 = vpack.c.bf16 %v661_v35, %v661_v35 }
 0x105   : > { %v1479_v38 = vmul.f32 0.25, %v1450_v33 }
 0x106   : > { %699 = vst.msk [vmem:[#allocation2 + $0x30] sm:$0xf] %vm686_vm1, %v682_v23 }
 0x107   : > { %v1495_v39 = vpack.c.bf16 %v1479_v38, %v1479_v38  ;;  %v2944_v38 = vld [vmem:[#allocation2 + $0x28] sm:$0xff] }
 0x109   : > { %v1659_v42 = vunpack.c.l.b16 %v1495_v39  ;;  %v662_v45 = vpop.f32.mrf.mxu0  ;;  %v2943_v39 = vld [vmem:[#allocation2 + $0x20] sm:$0xff] }
 0x10a   : > { %v1452_v43 = vpop.f32.mrf.mxu3  ;;  %v663_v46 = vadd.f32 %v662_v45, %v536_v32  ;;  %v3065_v32 = vld [vmem:[%s3920_s8 + $0x1] ss:$0 sm:$0xff] }
 0x10b   : > { %v1660_v44 = vpack.c.b16 %v1659_v42, %v1658_v40  ;;  %v1453_v47 = vadd.f32 %v1452_v43, %v1313_v61  ;;  %v3066_v43 = vld [vmem:[%s3920_s8] ss:$0 sm:$0xff] }
 0x10c   : > { %v683_v48 = vpack.c.bf16 %v663_v46, %v663_v46 }
 0x10d   : > { %3060 = vxpose.binary.xlu1.c.b16.start.end [1/2] (short) (narrow) %v1615_v26, %v1660_v44, 16  ;;  %v1480_v7 = vmul.f32 0.25, %v1453_v47 }
 0x10e   : > { %700 = vst.msk [vmem:[#allocation2 + $0x34] sm:$0xf] %vm686_vm1, %v683_v48 }
 0x10f   : > { %v1496_v57 = vpack.c.bf16 %v1480_v7, %v1480_v7 }
 0x111   : > { %v665_v54 = vpop.f32.mrf.mxu0  ;;  %v1703_v62 = vunpack.c.l.b16 %v1496_v57 }
 0x112   : > { %v1454_v50 = vpop.f32.mrf.mxu3  ;;  %v666_v56 = vadd.f32 %v665_v54, %v541_v51 }
 0x113   : > { %v1455_v52 = vadd.f32 %v1454_v50, %v3581_v53 }
 0x114   : > { %v684_v59 = vpack.c.bf16 %v666_v56, %v666_v56 }
 0x115   : > { %v1481_v58 = vmul.f32 0.25, %v1455_v52  ;;  %v2945_v45 = vld [vmem:[#allocation2 + $0x30] sm:$0xff] }
 0x116   : > { %701 = vst.msk [vmem:[#allocation2 + $0x38] sm:$0xf] %vm686_vm1, %v684_v59 }
 0x117   : > { %v1497_v60 = vpack.c.bf16 %v1481_v58, %v1481_v58 }
 0x119   : > { %v1704_v1 = vunpack.c.l.b16 %v1497_v60  ;;  %v667_v13 = vpop.f32.mrf.mxu0  ;;  %v3067_v60 = vld [vmem:[%s3920_s8 + $0x4] ss:$0 sm:$0xff] }
 0x11a   : > { %v1457_v61 = vpop.f32.mrf.mxu3  ;;  %v668_v4 = vadd.f32 %v667_v13, %v3673_v14 }
 0x11b   : > { %v1705_v2 = vpack.c.b16 %v1704_v1, %v1703_v62  ;;  %v1458_v5 = vadd.f32 %v1457_v61, %v3553_v21  ;;  %v3068_v62 = vld [vmem:[%s3920_s8 + $0x3] ss:$0 sm:$0xff] }
 0x11c   : > { %v685_v8 = vpack.c.bf16 %v668_v4, %v668_v4 }
 0x11d   : > { %1707 = vxpose.xlu2.c.b16.start.end [1/1] (short) (narrow) %v1705_v2, 16  ;;  %v1482_v53 = vmul.f32 0.25, %v1458_v5 }
 0x11e   : > { %702 = vst.msk [vmem:[#allocation2 + $0x3c] sm:$0xf] %vm686_vm1, %v685_v8 }
 0x11f   : > { %v1498_v15 = vpack.c.bf16 %v1482_v53, %v1482_v53 }
 0x121   : > { %v1748_v18 = vunpack.c.l.b16 %v1498_v15  ;;  %v3069_v15 = vld [vmem:[%s3920_s8 + $0x7] ss:$0 sm:$0xff] }
 0x122   : > { %v1459_v10 = vpop.f32.mrf.mxu3 }
 0x123   : > { %v1460_v12 = vadd.f32 %v1459_v10, %v3636_v37 }
 0x125   : > { %v1483_v16 = vmul.f32 0.25, %v1460_v12  ;;  %v2946_v40 = vld [vmem:[#allocation2 + $0x38] sm:$0xff] }
 0x127   : > { %v1499_v17 = vpack.c.bf16 %v1483_v16, %v1483_v16  ;;  %v3070_v16 = vld [vmem:[%s3920_s8 + $0x6] ss:$0 sm:$0xff] }
 0x129   : > { %v1749_v19 = vunpack.c.l.b16 %v1499_v17 }
 0x12a   : > { %v1462_v20 = vpop.f32.mrf.mxu3 }
 0x12b   : > { %v1750_v0 = vpack.c.b16 %v1749_v19, %v1748_v18  ;;  %v1463_v29 = vadd.f32 %v1462_v20, %v1333_v41  ;;  %v824_v41 = vpop.f32.mrf.mxu2 }
 0x12c   : > { %v825_v46 = vadd.f32 %v3065_v32, %v824_v41 }
 0x12d   : > { %1752 = vxpose.xlu0.c.b16.start.end [1/1] (short) (narrow) %v1750_v0, 16  ;;  %v1484_v31 = vmul.f32 0.25, %v1463_v29 }
 0x12f   : > { %v1500_v34 = vpack.c.bf16 %v1484_v31, %v1484_v31 }
 0x132   : > { %v1464_v22 = vpop.f32.mrf.mxu3 }
 0x133   : > { %v1465_v27 = vadd.f32 %v1464_v22, %v3655_v55  ;;  %v758_v42 = vpop.f32.mrf.mxu1  ;;  %v826_v48 = vpop.f32.mrf.mxu2 }
 0x134   : > { %v759_v47 = vadd.f32 %v3066_v43, %v758_v42  ;;  %v827_v50 = vadd.f32 %v3065_v32, %v826_v48 }
 0x135   : > { %v1485_v30 = vmul.f32 0.25, %v1465_v27 }
 0x136   : > { %v2964_v52 = vpack.c.bf16 %v827_v50, %v825_v46 }
 0x137   : > { %v1501_v33 = vpack.c.bf16 %v1485_v30, %v1485_v30 }
 0x138   : > { %2965 = vst [vmem:[#allocation3] sm:$0xff] %v2964_v52  }
 0x139   : > { %v1794_v35 = vunpack.c.l.b16 %v1501_v33 }
 0x13a   : > { %v1467_v14 = vpop.f32.mrf.mxu3 }
 0x13b   : > { %v1468_v21 = vadd.f32 %v1467_v14, %v3610_v6  ;;  %v1793_v6 = vunpack.c.l.b16 %v1500_v34  ;;  %v760_v7 = vpop.f32.mrf.mxu1 }
 0x13c   : > { %v761_v51 = vadd.f32 %v3066_v43, %v760_v7 }
 0x13d   : > { %v1486_v9 = vmul.f32 0.25, %v1468_v21  ;;  %v1795_v36 = vpack.c.b16 %v1794_v35, %v1793_v6 }
 0x13e   : > { %v2959_v54 = vpack.c.bf16 %v761_v51, %v759_v47 }
 0x13f   : > { %v1502_v25 = vpack.c.bf16 %v1486_v9, %v1486_v9 }
 0x140   : > { %2960 = vst [vmem:[#allocation3 + $0x30] sm:$0xff] %v2959_v54  }
 0x141   : > { %v1838_v37 = vunpack.c.l.b16 %v1502_v25  ;;  %v2948_v25 = vld [vmem:[#allocation3] sm:$0xff] }
 0x142   : > { %v1469_v49 = vpop.f32.mrf.mxu3 }
 0x143   : > { %v1470_v24 = vadd.f32 %v1469_v49, %v3599_v3 }
 0x145   : > { %v1487_v26 = vmul.f32 0.25, %v1470_v24 }
 0x147   : > { %v1503_v63 = vpack.c.bf16 %v1487_v26, %v1487_v26  ;;  %v2947_v24 = vld [vmem:[#allocation3 + $0x30] sm:$0xff] }
 0x149   : > { %v1839_v11 = vunpack.c.l.b16 %v1503_v63 }
 0x14a   : > { %v1025_v58 = vpop.f32.mrf.mxu2 }
 0x14b   : > { %v1840_v28 = vpack.c.b16 %v1839_v11, %v1838_v37  ;;  %v1026_v1 = vadd.f32 %v3067_v60, %v1025_v58 }
 0x14d   : > { %1842 = vxpose.xlu0.c.b16.start.end [1/1] (short) (narrow) %v1840_v28, 16 }
 0x152   : > { %v1027_v13 = vpop.f32.mrf.mxu2 }
 0x153   : > { %v1028_v4 = vadd.f32 %v3067_v60, %v1027_v13 }
 0x155   : > { %v2979_v8 = vpack.c.bf16 %v1028_v4, %v1026_v1 }
 0x157   : > { %2980 = vst [vmem:[#allocation3 + $0x8] sm:$0xff] %v2979_v8  }
 0x15d   : > { %1797 = vxpose.xlu0.c.b16.start.end [1/1] (short) (narrow) %v1795_v36, 16 }
 0x15e   : > { %v2951_v63 = vld [vmem:[#allocation3 + $0x8] sm:$0xff] }
 0x161   : > { %v958_v59 = vpop.f32.mrf.mxu1 }
 0x162   : > { %v959_v61 = vadd.f32 %v3068_v62, %v958_v59  ;;  %v1226_v10 = vpop.f32.mrf.mxu2 }
 0x163   : > { %v1227_v17 = vadd.f32 %v3069_v15, %v1226_v10 }
 0x169   : > { %v960_v2 = vpop.f32.mrf.mxu1 }
 0x16a   : > { %v961_v5 = vadd.f32 %v3068_v62, %v960_v2  ;;  %v1228_v19 = vpop.f32.mrf.mxu2 }
 0x16b   : > { %v1229_v0 = vadd.f32 %v3069_v15, %v1228_v19 }
 0x16c   : > { %v2974_v53 = vpack.c.bf16 %v961_v5, %v959_v61 }
 0x16d   : > { %v2994_v14 = vpack.c.bf16 %v1229_v0, %v1227_v17 }
 0x16e   : > { %2975 = vst [vmem:[#allocation3 + $0x10] sm:$0xff] %v2974_v53  }
 0x16f   : > { %2995 = vst [vmem:[#allocation3 + $0x38] sm:$0xff] %v2994_v14  }
 0x171   : > { %v1159_v12 = vpop.f32.mrf.mxu1 }
 0x172   : > { %v1160_v18 = vadd.f32 %v3070_v16, %v1159_v12 }
 0x175   : > { %v2950_v26 = vld [vmem:[#allocation3 + $0x10] sm:$0xff] }
 0x179   : > { %v1161_v20 = vpop.f32.mrf.mxu1 }
 0x17a   : > { %v1162_v22 = vadd.f32 %v3070_v16, %v1161_v20 }
 0x17c   : > { %v2989_v21 = vpack.c.bf16 %v1162_v22, %v1160_v18 }
 0x17e   : > { %2990 = vst [vmem:[#allocation3 + $0x28] sm:$0xff] %v2989_v21  }
 0x199   : > { %v3058_v3 = vpop.trf.xlu0 }
 0x19a   : > { %2802 = vmatmul.msk.bf16.vlgmr.msrb.gmra.mxu2 %vm1548_vm2, %v3058_v3 }
 0x19b   : > { %1784 = vmatpush.bf16.msrb.mxu2 %v2944_v38 }
 0x1a1   : > { %v3059_v23 = vpop.trf.xlu0 }
 0x1a2   : > { %2797 = vmatmul.msk.bf16.vlgmr.msrb.gmra.mxu1 %vm1548_vm2, %v3059_v23 }
 0x1a3   : > { %1739 = vmatpush.bf16.msrb.mxu1 %v2943_v39 }
 0x1b9   : > { %v3061_v55 = vpop.trf.xlu1 }
 0x1ba   : > { %2812 = vmatmul.msk.bf16.vlgmr.msra.gmra.mxu2 %vm1548_vm2, %v3061_v55 }
 0x1bb   : > { %1874 = vmatpush.bf16.msra.mxu2 %v2946_v40 }
 0x1be   : > { %v1715_v56 = vpop.trf.xlu2 }
 0x1c1   : > { %v3062_v44 = vpop.trf.xlu1 }
 0x1c2   : > { %2807 = vmatmul.msk.bf16.vlgmr.msra.gmra.mxu1 %vm1548_vm2, %v3062_v44 }
 0x1c3   : > { %1829 = vmatpush.bf16.msra.mxu1 %v2945_v45 }
 0x1d2   : > { %2817 = vmatmul.msk.bf16.vlgmr.msrb.gmra.mxu1 %vm1548_vm2, %v1715_v56 }
 0x1d3   : > { %2110 = vmatpush.bf16.msrb.mxu1 %v2947_v24 }
 0x1d9   : > { %v1760_v57 = vpop.trf.xlu0 }
 0x1da   : > { %2822 = vmatmul.msk.bf16.vlgmr.msrb.gmra.mxu2 %vm1548_vm2, %v1760_v57 }
 0x1db   : > { %2138 = vmatpush.bf16.msrb.mxu2 %v2948_v25 }
 0x1f9   : > { %v1850_v9 = vpop.trf.xlu0 }
 0x1fa   : > { %2832 = vmatmul.msk.bf16.vlgmr.msra.gmra.mxu2 %vm1548_vm2, %v1850_v9 }
 0x1fb   : > { %2222 = vmatpush.bf16.msra.mxu2 %v2951_v63 }
 0x209   : > { %v1805_v49 = vpop.trf.xlu0 }
 0x20a   : > { %2827 = vmatmul.msk.bf16.vlgmr.msra.gmra.mxu1 %vm1548_vm2, %v1805_v49 }
 0x20b   : > { %2194 = vmatpush.bf16.msra.mxu1 %v2950_v26 }
 0x21d   : > { %v1606_v37 = vpop.f32.mrf.mxu2 }
 0x21e   : > { %v1887_v11 = vsel %vm1548_vm2, %v1606_v37, -inf }
 0x21f   : > { %1888 = vmax.xlane.f32.xlu1 %v1887_v11  ;;  %v1561_v27 = vpop.f32.mrf.mxu1 }
 0x220   : > { %v1881_v28 = vsel %vm1548_vm2, %v1561_v27, -inf }
 0x221   : > { %1882 = vmax.xlane.f32.xlu0 %v1881_v28 }
 0x225   : > { %v1608_v29 = vpop.f32.mrf.mxu2 }
 0x226   : > { %v1890_v30 = vsel %vm1548_vm2, %v1608_v29, -inf }
 0x227   : > { %1891 = vmax.xlane.f32.xlu2 %v1890_v30  ;;  %v1563_v31 = vpop.f32.mrf.mxu1 }
 0x228   : > { %v1884_v33 = vsel %vm1548_vm2, %v1563_v31, -inf }
 0x229   : > { %1885 = vmax.xlane.f32.xlu1 %v1884_v33 }
 0x23d   : > { %v3724_v34 = vpop.f32.mrf.mxu2 }
 0x23e   : > { %v1899_v43 = vsel %vm1548_vm2, %v3724_v34, -inf }
 0x23f   : > { %v3726_v35 = vpop.f32.mrf.mxu1 }
 0x240   : > { %v1893_v6 = vsel %vm1548_vm2, %v3726_v35, -inf }
 0x241   : > { %1894 = vmax.xlane.f32.xlu2 %v1893_v6 }
 0x245   : > { %v3730_v36 = vpop.f32.mrf.mxu2 }
 0x246   : > { %v1902_v3 = vsel %vm1548_vm2, %v3730_v36, -inf }
 0x247   : > { %v3734_v38 = vpop.f32.mrf.mxu1 }
 0x248   : > { %v1896_v23 = vsel %vm1548_vm2, %v3734_v38, -inf }
 0x249   : > { %1903 = vmax.xlane.f32.xlu2 %v1902_v3  ;;  %1897 = vmax.xlane.f32.xlu0 %v1896_v23 }
 0x24f   : > { %v3738_v39 = vpop.f32.mrf.mxu1 }
 0x250   : > { %v1905_v55 = vsel %vm1548_vm2, %v3738_v39, -inf }
 0x251   : > { %1906 = vmax.xlane.f32.xlu1 %v1905_v55 }
 0x257   : > { %v3742_v40 = vpop.f32.mrf.mxu1 }
 0x258   : > { %v1908_v41 = vsel %vm1548_vm2, %v3742_v40, -inf }
 0x259   : > { %1909 = vmax.xlane.f32.xlu1 %v1908_v41 }
 0x25d   : > { %v3746_v42 = vpop.f32.mrf.mxu2 }
 0x25e   : > { %v1911_v32 = vsel %vm1548_vm2, %v3746_v42, -inf }
 0x25f   : > { %1912 = vmax.xlane.f32.xlu2 %v1911_v32 }
 0x261   : > { %1900 = vmax.xlane.f32.xlu1 %v1899_v43 }
 0x265   : > { %v3752_v44 = vpop.f32.mrf.mxu2 }
 0x266   : > { %v1914_v48 = vsel %vm1548_vm2, %v3752_v44, -inf }
 0x27d   : > { %v3754_v45 = vpop.f32.mrf.mxu2 }
 0x27e   : > { %v1923_v46 = vsel %vm1548_vm2, %v3754_v45, -inf }
 0x27f   : > { %1924 = vmax.xlane.f32.xlu0 %v1923_v46 }
 0x285   : > { %v3758_v47 = vpop.f32.mrf.mxu2 }
 0x286   : > { %v1926_v7 = vsel %vm1548_vm2, %v3758_v47, -inf }
 0x287   : > { %1915 = vmax.xlane.f32.xlu0 %v1914_v48  ;;  %1927 = vmax.xlane.f32.xlu1 %v1926_v7  ;;  %v3764_v50 = vpop.f32.mrf.mxu1 }
 0x288   : > { %v1917_v51 = vsel %vm1548_vm2, %v3764_v50, -inf }
 0x28f   : > { %1918 = vmax.xlane.f32.xlu1 %v1917_v51  ;;  %v3768_v52 = vpop.f32.mrf.mxu1 }
 0x290   : > { %v1920_v54 = vsel %vm1548_vm2, %v3768_v52, -inf }
 0x291   : > { %1921 = vmax.xlane.f32.xlu2 %v1920_v54 }
 0x292   : > { %v1889_v56 = vpop.xlane.xlu1 %1888 }
 0x293   : > { %v1931_v57 = vsub.f32 %v1606_v37, %v1889_v56 }
 0x294   : > { %v1883_v58 = vpop.xlane.xlu0 %1882 }
 0x295   : > { %v1949_v59 = vmul.f32 1.442695, %v1931_v57  ;;  %v1929_v60 = vsub.f32 %v1561_v27, %v1883_v58 }
 0x297   : > { %3072 = vpow2.f32 %v1949_v59  ;;  %v1945_v62 = vmul.f32 1.442695, %v1929_v60 }
 0x299   : > { %3074 = vpow2.f32 %v1945_v62 }
 0x29a   : > { %v1892_v1 = vpop.xlane.xlu2 %1891 }
 0x29b   : > { %v1932_v61 = vsub.f32 %v1608_v29, %v1892_v1 }
 0x29c   : > { %v1886_v13 = vpop.xlane.xlu1 %1885 }
 0x29d   : > { %v3772_v2 = vpop.eup %3072  ;;  %v1951_v4 = vmul.f32 1.442695, %v1932_v61  ;;  %v1930_v5 = vsub.f32 %v1563_v31, %v1886_v13 }
 0x29e   : > { %v1983_v8 = vsel %vm1548_vm2, %v3772_v2, 0.0 }
 0x29f   : > { %v3776_v53 = vpop.eup %3074  ;;  %3076 = vpow2.f32 %v1951_v4  ;;  %v1947_v10 = vmul.f32 1.442695, %v1930_v5  ;;  %1984 = vadd.xlane.f32.xlu0 %v1983_v8 }
 0x2a0   : > { %v1977_v12 = vsel %vm1548_vm2, %v3776_v53, 0.0 }
 0x2a1   : > { %3078 = vpow2.f32 %v1947_v10  ;;  %1978 = vadd.xlane.f32.xlu2 %v1977_v12 }
 0x2a5   : > { %v3780_v15 = vpop.eup %3076 }
 0x2a6   : > { %v1986_v16 = vsel %vm1548_vm2, %v3780_v15, 0.0 }
 0x2a7   : > { %v3784_v17 = vpop.eup %3078  ;;  %1987 = vadd.xlane.f32.xlu1 %v1986_v16 }
 0x2a8   : > { %v1980_v18 = vsel %vm1548_vm2, %v3784_v17, 0.0 }
 0x2a9   : > { %1981 = vadd.xlane.f32.xlu0 %v1980_v18 }
 0x2b4   : > { %v1895_v19 = vpop.xlane.xlu2 %1894 }
 0x2b5   : > { %v1933_v20 = vsub.f32 %v3726_v35, %v1895_v19 }
 0x2b7   : > { %v1953_v0 = vmul.f32 1.442695, %v1933_v20 }
 0x2b9   : > { %3080 = vpow2.f32 %v1953_v0 }
 0x2bc   : > { %v1904_v22 = vpop.xlane.xlu2 %1903  ;;  %v1898_v24 = vpop.xlane.xlu0 %1897 }
 0x2bd   : > { %v1936_v14 = vsub.f32 %v3730_v36, %v1904_v22  ;;  %v1934_v37 = vsub.f32 %v3734_v38, %v1898_v24 }
 0x2bf   : > { %v3790_v21 = vpop.eup %3080  ;;  %v1959_v9 = vmul.f32 1.442695, %v1936_v14  ;;  %v1955_v28 = vmul.f32 1.442695, %v1934_v37 }
 0x2c0   : > { %v1989_v49 = vsel %vm1548_vm2, %v3790_v21, 0.0 }
 0x2c1   : > { %3082 = vpow2.f32 %v1959_v9  ;;  %1990 = vadd.xlane.f32.xlu0 %v1989_v49 }
 0x2c4   : > { %v1907_v25 = vpop.xlane.xlu1 %1906 }
 0x2c5   : > { %v1937_v26 = vsub.f32 %v3738_v39, %v1907_v25 }
 0x2c7   : > { %v3795_v63 = vpop.eup %3082  ;;  %v1961_v11 = vmul.f32 1.442695, %v1937_v26 }
 0x2c8   : > { %v1998_v27 = vsel %vm1548_vm2, %v3795_v63, 0.0 }
 0x2c9   : > { %3084 = vpow2.f32 %v1961_v11  ;;  %1999 = vadd.xlane.f32.xlu0 %v1998_v27 }
 0x2ca   : > { %3086 = vpow2.f32 %v1955_v28 }
 0x2cc   : > { %v1910_v29 = vpop.xlane.xlu1 %1909 }
 0x2cd   : > { %v1938_v30 = vsub.f32 %v3742_v40, %v1910_v29 }
 0x2cf   : > { %v3801_v31 = vpop.eup %3084  ;;  %v1963_v33 = vmul.f32 1.442695, %v1938_v30 }
 0x2d0   : > { %v2001_v35 = vsel %vm1548_vm2, %v3801_v31, 0.0  ;;  %v3806_v38 = vpop.eup %3086 }
 0x2d1   : > { %3088 = vpow2.f32 %v1963_v33  ;;  %2002 = vadd.xlane.f32.xlu1 %v2001_v35  ;;  %v1992_v32 = vsel %vm1548_vm2, %v3806_v38, 0.0 }
 0x2d2   : > { %v1913_v6 = vpop.xlane.xlu2 %1912 }
 0x2d3   : > { %v1939_v36 = vsub.f32 %v3746_v42, %v1913_v6 }
 0x2d4   : > { %v1901_v3 = vpop.xlane.xlu1 %1900 }
 0x2d5   : > { %v1965_v23 = vmul.f32 1.442695, %v1939_v36  ;;  %v1935_v39 = vsub.f32 %v3724_v34, %v1901_v3 }
 0x2d7   : > { %v3809_v55 = vpop.eup %3088  ;;  %3090 = vpow2.f32 %v1965_v23  ;;  %v1957_v40 = vmul.f32 1.442695, %v1935_v39  ;;  %v2954_v23 = vld [vmem:[#allocation3 + $0x38] sm:$0xff] }
 0x2d8   : > { %v2004_v41 = vsel %vm1548_vm2, %v3809_v55, 0.0 }
 0x2d9   : > { %3092 = vpow2.f32 %v1957_v40  ;;  %2005 = vadd.xlane.f32.xlu2 %v2004_v41  ;;  %1993 = vadd.xlane.f32.xlu1 %v1992_v32 }
 0x2dd   : > { %v3815_v42 = vpop.eup %3090 }
 0x2de   : > { %v2007_v43 = vsel %vm1548_vm2, %v3815_v42, 0.0 }
 0x2df   : > { %v3819_v46 = vpop.eup %3092  ;;  %2008 = vadd.xlane.f32.xlu0 %v2007_v43 }
 0x2e0   : > { %v1995_v34 = vsel %vm1548_vm2, %v3819_v46, 0.0 }
 0x2e1   : > { %1996 = vadd.xlane.f32.xlu2 %v1995_v34 }
 0x2f2   : > { %v1925_v48 = vpop.xlane.xlu0 %1924 }
 0x2f3   : > { %v1943_v7 = vsub.f32 %v3754_v45, %v1925_v48 }
 0x2f5   : > { %v1973_v51 = vmul.f32 1.442695, %v1943_v7 }
 0x2f7   : > { %3094 = vpow2.f32 %v1973_v51 }
 0x2fa   : > { %v1928_v54 = vpop.xlane.xlu1 %1927  ;;  %v1916_v56 = vpop.xlane.xlu0 %1915 }
 0x2fb   : > { %v1944_v57 = vsub.f32 %v3758_v47, %v1928_v54  ;;  %v1940_v58 = vsub.f32 %v3752_v44, %v1916_v56 }
 0x2fd   : > { %v3826_v59 = vpop.eup %3094  ;;  %v1975_v60 = vmul.f32 1.442695, %v1944_v57  ;;  %v1967_v62 = vmul.f32 1.442695, %v1940_v58 }
 0x2fe   : > { %v2019_v1 = vsel %vm1548_vm2, %v3826_v59, 0.0 }
 0x2ff   : > { %3096 = vpow2.f32 %v1975_v60  ;;  %2020 = vadd.xlane.f32.xlu1 %v2019_v1 }
 0x300   : > { %3098 = vpow2.f32 %v1967_v62 }
 0x302   : > { %v1919_v61 = vpop.xlane.xlu1 %1918 }
 0x303   : > { %v1941_v45 = vsub.f32 %v3764_v50, %v1919_v61 }
 0x304   : > { %v1922_v13 = vpop.xlane.xlu2 %1921 }
 0x305   : > { %v3831_v4 = vpop.eup %3096  ;;  %v1969_v5 = vmul.f32 1.442695, %v1941_v45  ;;  %v1942_v47 = vsub.f32 %v3768_v52, %v1922_v13 }
 0x306   : > { %v3834_v44 = vpop.eup %3098  ;;  %v2022_v8 = vsel %vm1548_vm2, %v3831_v4, 0.0 }
 0x307   : > { %3100 = vpow2.f32 %v1969_v5  ;;  %v1971_v10 = vmul.f32 1.442695, %v1942_v47  ;;  %2023 = vadd.xlane.f32.xlu2 %v2022_v8  ;;  %v2010_v12 = vsel %vm1548_vm2, %v3834_v44, 0.0 }
 0x308   : > { %2011 = vadd.xlane.f32.xlu1 %v2010_v12 }
 0x309   : > { %3102 = vpow2.f32 %v1971_v10 }
 0x30d   : > { %v3840_v50 = vpop.eup %3100 }
 0x30e   : > { %v2013_v16 = vsel %vm1548_vm2, %v3840_v50, 0.0 }
 0x30f   : > { %v3844_v18 = vpop.eup %3102  ;;  %2014 = vadd.xlane.f32.xlu2 %v2013_v16 }
 0x310   : > { %v2016_v52 = vsel %vm1548_vm2, %v3844_v18, 0.0 }
 0x311   : > { %2017 = vadd.xlane.f32.xlu0 %v2016_v52 }
 0x312   : > { %v1985_v19 = vpop.xlane.xlu0 %1984 }
 0x313   : > { %3104 = vrcp.f32 %v1985_v19 }
 0x314   : > { %v1979_v20 = vpop.xlane.xlu2 %1978 }
 0x315   : > { %3106 = vrcp.f32 %v1979_v20 }
 0x319   : > { %v3105_v22 = vpop.eup %3104 }
 0x31a   : > { %v1988_v0 = vpop.xlane.xlu1 %1987  ;;  %v2043_v49 = vmul.f32 %v3105_v22, %v3772_v2  ;;  %v2953_v2 = vld [vmem:[#allocation3 + $0x28] sm:$0xff] }
 0x31b   : > { %3108 = vrcp.f32 %v1988_v0  ;;  %v3107_v9 = vpop.eup %3106 }
 0x31c   : > { %v1982_v14 = vpop.xlane.xlu0 %1981  ;;  %v2041_v24 = vmul.f32 %v3107_v9, %v3776_v53  ;;  %v2059_v26 = vpack.c.bf16 %v2043_v49, %v2043_v49 }
 0x31d   : > { %3110 = vrcp.f32 %v1982_v14 }
 0x31e   : > { %v2057_v27 = vpack.c.bf16 %v2041_v24, %v2041_v24  ;;  %v2119_v30 = vunpack.c.l.b16 %v2059_v26 }
 0x320   : > { %v2091_v6 = vunpack.c.l.b16 %v2057_v27 }
 0x321   : > { %v3109_v25 = vpop.eup %3108 }
 0x322   : > { %v2044_v37 = vmul.f32 %v3109_v25, %v3780_v15 }
 0x323   : > { %v3111_v11 = vpop.eup %3110 }
 0x324   : > { %v2060_v28 = vpack.c.bf16 %v2044_v37, %v2044_v37  ;;  %v2042_v29 = vmul.f32 %v3111_v11, %v3784_v17 }
 0x326   : > { %v2120_v33 = vunpack.c.l.b16 %v2060_v28  ;;  %v2058_v35 = vpack.c.bf16 %v2042_v29, %v2042_v29 }
 0x328   : > { %v2121_v36 = vpack.c.b16 %v2120_v33, %v2119_v30  ;;  %v2092_v3 = vunpack.c.l.b16 %v2058_v35 }
 0x32a   : > { %v2093_v39 = vpack.c.b16 %v2092_v3, %v2091_v6  ;;  %2842 = vmatmul.msk.bf16.vlgmr.msrb.gmra.mxu2 %vm1548_vm2, %v2121_v36 }
 0x32b   : > { %2306 = vmatpush.bf16.msrb.mxu2 %v2954_v23 }
 0x32c   : > { %2837 = vmatmul.msk.bf16.vlgmr.msrb.gmra.mxu1 %vm1548_vm2, %v2093_v39 }
 0x32d   : > { %2278 = vmatpush.bf16.msrb.mxu1 %v2953_v2 }
 0x334   : > { %v1991_v53 = vpop.xlane.xlu0 %1990 }
 0x33c   : > { %v2000_v17 = vpop.xlane.xlu0 %1999 }
 0x344   : > { %v2003_v15 = vpop.xlane.xlu1 %2002 }
 0x345   : > { %3112 = vrcp.f32 %v2003_v15 }
 0x346   : > { %3114 = vrcp.f32 %v1991_v53 }
 0x34b   : > { %v3113_v32 = vpop.eup %3112 }
 0x34c   : > { %v2006_v40 = vpop.xlane.xlu2 %2005  ;;  %v1994_v41 = vpop.xlane.xlu1 %1993  ;;  %v2049_v34 = vmul.f32 %v3113_v32, %v3801_v31 }
 0x34d   : > { %3116 = vrcp.f32 %v2006_v40  ;;  %v3115_v43 = vpop.eup %3114 }
 0x34e   : > { %3118 = vrcp.f32 %v1994_v41  ;;  %v2045_v48 = vmul.f32 %v3115_v43, %v3790_v21  ;;  %v2065_v54 = vpack.c.bf16 %v2049_v34, %v2049_v34 }
 0x34f   : > { %3120 = vrcp.f32 %v2000_v17 }
 0x350   : > { %v2061_v60 = vpack.c.bf16 %v2045_v48, %v2045_v48  ;;  %v2203_v13 = vunpack.c.l.b16 %v2065_v54 }
 0x352   : > { %v2147_v31 = vunpack.c.l.b16 %v2061_v60  ;;  %v2009_v20 = vpop.xlane.xlu0 %2008 }
 0x353   : > { %v3117_v7 = vpop.eup %3116 }
 0x354   : > { %v3119_v51 = vpop.eup %3118  ;;  %v2050_v56 = vmul.f32 %v3117_v7, %v3809_v55  ;;  %v1997_v57 = vpop.xlane.xlu2 %1996 }
 0x355   : > { %v3121_v58 = vpop.eup %3120  ;;  %v2046_v62 = vmul.f32 %v3119_v51, %v3806_v38  ;;  %3122 = vrcp.f32 %v1997_v57 }
 0x356   : > { %v2066_v1 = vpack.c.bf16 %v2050_v56, %v2050_v56  ;;  %v2048_v45 = vmul.f32 %v3121_v58, %v3795_v63 }
 0x357   : > { %v2062_v61 = vpack.c.bf16 %v2046_v62, %v2046_v62 }
 0x358   : > { %v2204_v5 = vunpack.c.l.b16 %v2066_v1  ;;  %v2064_v12 = vpack.c.bf16 %v2048_v45, %v2048_v45 }
 0x359   : > { %v2148_v47 = vunpack.c.l.b16 %v2062_v61 }
 0x35a   : > { %v2205_v21 = vpack.c.b16 %v2204_v5, %v2203_v13  ;;  %v2176_v16 = vunpack.c.l.b16 %v2064_v12 }
 0x35b   : > { %v3123_v8 = vpop.eup %3122  ;;  %v2149_v10 = vpack.c.b16 %v2148_v47, %v2147_v31 }
 0x35c   : > { %v2047_v55 = vmul.f32 %v3123_v8, %v3819_v46  ;;  %2857 = vmatmul.msk.bf16.vlgmr.msra.gmra.mxu2 %vm1548_vm2, %v2205_v21  ;;  %v3071_v21 = vld [vmem:[%s3921_s9] ss:$0 sm:$0xff] }
 0x35d   : > { %2847 = vmatmul.msk.bf16.vlgmr.msrb.gmra.mxu0 %vm1548_vm2, %v2149_v10 }
 0x35e   : > { %v2063_v38 = vpack.c.bf16 %v2047_v55, %v2047_v55 }
 0x360   : > { %v2175_v52 = vunpack.c.l.b16 %v2063_v38 }
 0x362   : > { %v2177_v19 = vpack.c.b16 %v2176_v16, %v2175_v52 }
 0x364   : > { %2852 = vmatmul.msk.bf16.vlgmr.msra.gmra.mxu1 %vm1548_vm2, %v2177_v19 }
 0x372   : > { %v2021_v63 = vpop.xlane.xlu1 %2020 }
 0x373   : > { %3124 = vrcp.f32 %v2021_v63 }
 0x374   : > { %3126 = vrcp.f32 %v2009_v20 }
 0x379   : > { %v3125_v22 = vpop.eup %3124 }
 0x37a   : > { %v2024_v0 = vpop.xlane.xlu2 %2023  ;;  %v3127_v9 = vpop.eup %3126  ;;  %v2055_v46 = vmul.f32 %v3125_v22, %v3826_v59 }
 0x37b   : > { %3128 = vrcp.f32 %v2024_v0  ;;  %v2012_v14 = vpop.xlane.xlu1 %2011  ;;  %v2051_v49 = vmul.f32 %v3127_v9, %v3815_v42 }
 0x37c   : > { %3130 = vrcp.f32 %v2012_v14  ;;  %v2071_v26 = vpack.c.bf16 %v2055_v46, %v2055_v46 }
 0x37d   : > { %v2067_v27 = vpack.c.bf16 %v2051_v49, %v2051_v49 }
 0x37e   : > { %v2287_v35 = vunpack.c.l.b16 %v2071_v26 }
 0x37f   : > { %v2231_v36 = vunpack.c.l.b16 %v2067_v27 }
 0x381   : > { %v3129_v24 = vpop.eup %3128 }
 0x382   : > { %v3131_v25 = vpop.eup %3130  ;;  %v2056_v37 = vmul.f32 %v3129_v24, %v3831_v4  ;;  %v2015_v11 = vpop.xlane.xlu2 %2014 }
 0x383   : > { %v2052_v28 = vmul.f32 %v3131_v25, %v3834_v44  ;;  %3132 = vrcp.f32 %v2015_v11 }
 0x384   : > { %v2072_v29 = vpack.c.bf16 %v2056_v37, %v2056_v37  ;;  %v2018_v30 = vpop.xlane.xlu0 %2017 }
 0x385   : > { %v2068_v33 = vpack.c.bf16 %v2052_v28, %v2052_v28  ;;  %3134 = vrcp.f32 %v2018_v30 }
 0x386   : > { %v2288_v6 = vunpack.c.l.b16 %v2072_v29 }
 0x387   : > { %v2232_v59 = vunpack.c.l.b16 %v2068_v33 }
 0x388   : > { %v2289_v3 = vpack.c.b16 %v2288_v6, %v2287_v35 }
 0x389   : > { %v3133_v42 = vpop.eup %3132  ;;  %v2233_v23 = vpack.c.b16 %v2232_v59, %v2231_v36 }
 0x38a   : > { %v2053_v39 = vmul.f32 %v3133_v42, %v3840_v50  ;;  %2872 = vmatmul.msk.bf16.vlgmr.msrb.gmra.mxu2 %vm1548_vm2, %v2289_v3 }
 0x38b   : > { %v3135_v4 = vpop.eup %3134  ;;  %2862 = vmatmul.msk.bf16.vlgmr.msra.gmra.mxu0 %vm1548_vm2, %v2233_v23 }
 0x38c   : > { %v2069_v44 = vpack.c.bf16 %v2053_v39, %v2053_v39  ;;  %v2054_v2 = vmul.f32 %v3135_v4, %v3844_v18 }
 0x38e   : > { %v2070_v53 = vpack.c.bf16 %v2054_v2, %v2054_v2  ;;  %v2259_v15 = vunpack.c.l.b16 %v2069_v44 }
 0x390   : > { %v2260_v17 = vunpack.c.l.b16 %v2070_v53 }
 0x392   : > { %v2261_v40 = vpack.c.b16 %v2260_v17, %v2259_v15 }
 0x394   : > { %2867 = vmatmul.msk.bf16.vlgmr.msrb.gmra.mxu1 %vm1548_vm2, %v2261_v40 }
 0x3a9   : > { %v2112_v41 = vpop.f32.mrf.mxu1 }
 0x3ad   : > { %v2140_v32 = vpop.f32.mrf.mxu2 }
 0x3ae   : > { %v2313_v54 = vadd.f32 %v2140_v32, %v2112_v41 }
 0x3b1   : > { %v2114_v43 = vpop.f32.mrf.mxu1 }
 0x3b5   : > { %v2142_v34 = vpop.f32.mrf.mxu2 }
 0x3b6   : > { %v2320_v62 = vadd.f32 %v2142_v34, %v2114_v43 }
 0x3da   : > { %v2168_v50 = vpop.f32.mrf.mxu0 }
 0x3db   : > { %v2314_v56 = vadd.f32 %v2313_v54, %v2168_v50 }
 0x3df   : > { %v2224_v48 = vpop.f32.mrf.mxu2 }
 0x3e1   : > { %v2196_v7 = vpop.f32.mrf.mxu1 }
 0x3e2   : > { %v2170_v51 = vpop.f32.mrf.mxu0  ;;  %v2315_v18 = vadd.f32 %v2314_v56, %v2196_v7 }
 0x3e3   : > { %v2321_v61 = vadd.f32 %v2320_v62, %v2170_v51 }
 0x3e4   : > { %v2316_v1 = vadd.f32 %v2315_v18, %v2224_v48 }
 0x3e7   : > { %v2226_v57 = vpop.f32.mrf.mxu2 }
 0x3e9   : > { %v2198_v58 = vpop.f32.mrf.mxu1 }
 0x3ea   : > { %v2322_v31 = vadd.f32 %v2321_v61, %v2198_v58 }
 0x3ec   : > { %v2323_v12 = vadd.f32 %v2322_v31, %v2226_v57 }
 0x408   : > { %v2252_v60 = vpop.f32.mrf.mxu0 }
 0x409   : > { %v2317_v45 = vadd.f32 %v2316_v1, %v2252_v60 }
 0x40d   : > { %v2308_v13 = vpop.f32.mrf.mxu2 }
 0x410   : > { %v2254_v10 = vpop.f32.mrf.mxu0 }
 0x411   : > { %v2280_v5 = vpop.f32.mrf.mxu1  ;;  %v2324_v38 = vadd.f32 %v2323_v12, %v2254_v10 }
 0x412   : > { %v2318_v47 = vadd.f32 %v2317_v45, %v2280_v5 }
 0x414   : > { %v2319_v8 = vadd.f32 %v2318_v47, %v2308_v13 }
 0x415   : > { %v2310_v19 = vpop.f32.mrf.mxu2 }
 0x416   : > { %v2331_v55 = vadd.f32 %v3071_v21, %v2319_v8 }
 0x418   : > { %2333 = vst [vmem:[%s407_s29] sm:$0xff] %v2331_v55 }
 0x419   : > { %v2282_v16 = vpop.f32.mrf.mxu1 }
 0x41a   : > { %v2325_v52 = vadd.f32 %v2324_v38, %v2282_v16 }
 0x41c   : > { %v2326_v63 = vadd.f32 %v2325_v52, %v2310_v19 }
 0x41e   : > { %v2332_v20 = vadd.f32 %v3071_v21, %v2326_v63 }
 0x420   : > { %2334 = vst [vmem:[%s407_s29 + $0x8] sm:$0xff] %v2332_v20 }
 0x421   : > { %3163 = shalt.err (!%p3160_p5)
}
 0x422   : > { %s3217_s12 = smov 128   ;;  %s3218_s29 = smov 8  }
 0x423   : > { %2996 = dma.vmem_to_hbm [thread:$0]  (%p3314_p4), %s2351_s22, 256, %s2353_s30, %s2336_s16, %s3217_s12, %s3217_s12, %s3218_s29  }
 0x424 PF: > { %p3002_p6 = scmp.ge.s32.totalorder %s3214_s18, 2  ;;  %s2367_s20 = sand.u32 1, %s3194_s13  }
 0x425   : > { %s2368_s0 = scalar_lea.sflag [#allocation5], %s2367_s20 }
 0x426   : > { %p2999_p7 = pnand %p3002_p6, %p3321_p8 }
 0x428   : > { %p3000_p9 = pneg %p2999_p7 }
 0x42a   : > { %3189 = dma.done.wait (%p3000_p9), %s2368_s0, 256  }
 0x42b   : > { %3191 = vsyncadd (%p3000_p9), %s2368_s0, 4294967040  ;;  %s23_s18 = sadd.s32 1, %s3214_s18   ;;  %s3929_s13 = smov %s3198_s14 }
 0x42c   : > { %p20_p10 = scmp.ge.s32.totalorder %s23_s18, 4   ;;  %s3930_s14 = smov %s3202_s15 }
 0x42d   : > { %s3931_s15 = smov %s3327_s26  ;;  %s3932_s16 = smov %s3210_s17 }
 0x42e   : > { %s3933_s17 = smov %s3935_s21  ;;  %22 = sbr.rel (!%p20_p10) target bundleno = 7 (0x7), region = 126 }
 0x433   :  { %2374 = vsyncpa [#allocation5], 1 }
 0x434   :  { %2376 = vsyncpa [#allocation5 + $0x1], 1 }

</bundles_post_ra>
